<compile_context>
chip_gen: v6e
topology: v6e:2x2x1
jax: 0.10.0
libtpu: 0.0.40
codegen_flags: <defaults>
</compile_context>

<pallas_src>
import math
from functools import partial

import jax
import jax.numpy as jnp
import numpy as np
from jax.experimental import pallas as pl
from jax.experimental.pallas import tpu as pltpu


def _layernorm(v, w, b, eps=1e-5):
    # fp32 layernorm (matches the fp16-safe LayerNorm subclass: compute in f32)
    mu = jnp.mean(v, axis=-1, keepdims=True)
    var = jnp.mean(jnp.square(v - mu), axis=-1, keepdims=True)
    return (v - mu) * jax.lax.rsqrt(var + eps) * w + b


def _softmax_last(s):
    # explicit max-subtract softmax; the reciprocal goes to the EUP slot
    m = jnp.max(s, axis=-1, keepdims=True)
    e = jnp.exp(s - m)
    denom = jnp.sum(e, axis=-1, keepdims=True)
    return e * pl.reciprocal(denom, approx=True)


def fused_transformer_kernel(num_heads, bt, seq_len, width,
                             x_ref,
                             ln1w_ref, ln1b_ref, w_in_ref, b_in_ref,
                             w_out_ref, b_out_ref, ln2w_ref, ln2b_ref,
                             w_fc_ref, b_fc_ref, w_proj_ref, b_proj_ref,
                             o_ref, x_acc_ref):
    N, C, H = seq_len, width, num_heads
    dh = C // H
    l = pl.program_id(1)

    # Layer 0: pull the input tile into the persistent VMEM residual stream.
    @pl.when(l == 0)
    def _():
        for bi in range(bt):
            x_acc_ref[bi * N:(bi + 1) * N, :] = x_ref[bi].astype(jnp.float32)

    x = x_acc_ref[...]                            # (bt*N, C) f32 residual

    # ---- attention branch: x = x + out_proj(attn(ln_1(x))) ----
    h = _layernorm(x, ln1w_ref[...], ln1b_ref[...]).astype(jnp.bfloat16)
    qkv = (jnp.dot(h, w_in_ref[...], preferred_element_type=jnp.float32)
           + b_in_ref[...])                       # q scale folded into w_in/b_in
    qkv_bf = qkv.astype(jnp.bfloat16)

    per_batch = []
    for bi in range(bt):                          # static unroll (attention is per sample)
        r0 = bi * N
        acc = jnp.zeros((N, C), jnp.float32)
        for hh in range(H):                       # static unroll over heads
            c0 = hh * dh
            q = qkv_bf[r0:r0 + N, c0:c0 + dh]
            k = qkv_bf[r0:r0 + N, C + c0:C + c0 + dh]
            v = qkv_bf[r0:r0 + N, 2 * C + c0:2 * C + c0 + dh]
            s = jax.lax.dot_general(q, k, (((1,), (1,)), ((), ())),   # q @ k^T
                                    preferred_element_type=jnp.float32)
            p = _softmax_last(s).astype(jnp.bfloat16)
            o = jnp.dot(p, v, preferred_element_type=jnp.float32)    # (N, dh)
            # Fold this head's dh rows of out_proj directly into a full-width
            # (N, C) f32 accumulator: lane-dense, no masked column stores, no
            # attention scratch buffer at all.
            acc = acc + jnp.dot(o.astype(jnp.bfloat16),
                                w_out_ref[c0:c0 + dh, :],
                                preferred_element_type=jnp.float32)
        per_batch.append(acc)
    attn_out = per_batch[0] if bt == 1 else jnp.concatenate(per_batch, axis=0)
    x = x + attn_out + b_out_ref[...]

    # ---- MLP branch: x = x + c_proj(QuickGELU(c_fc(ln_2(x)))) ----
    h2 = _layernorm(x, ln2w_ref[...], ln2b_ref[...]).astype(jnp.bfloat16)
    d4 = 4 * C
    chunk = d4 if (d4 <= 512 or d4 % 512 != 0) else 512
    for c0 in range(0, d4, chunk):                # bound the (rows, 4C) live range
        fc = (jnp.dot(h2, w_fc_ref[:, c0:c0 + chunk],
                      preferred_element_type=jnp.float32)
              + b_fc_ref[:, c0:c0 + chunk])
        g = fc * jax.nn.sigmoid(1.702 * fc)       # QuickGELU
        x = x + jnp.dot(g.astype(jnp.bfloat16), w_proj_ref[c0:c0 + chunk, :],
                        preferred_element_type=jnp.float32)
    x = x + b_proj_ref[...]

    x_acc_ref[...] = x                            # carry residual to next layer

    @pl.when(l == pl.num_programs(1) - 1)
    def _():
        for bi in range(bt):
            o_ref[bi] = x[bi * N:(bi + 1) * N, :].astype(o_ref.dtype)


def _tpu_vmem_capacity():
    try:
        return int(pltpu.get_tpu_info().vmem_capacity_bytes)
    except (AttributeError, NotImplementedError, RuntimeError, TypeError, ValueError):
        return 64 << 20   # conservative (v7x per-core physical VMEM)


def _vmem_limit_bytes(rows, C):
    # double-buffered bf16 weights + biases, x/out pipeline buffers, the f32
    # residual scratch and the chunked MLP intermediates, plus margin; capped
    # generation-aware at 85% of physical VMEM.
    weights_per_layer = 2 * 12 * C * C            # bf16: 3C^2 + C^2 + 4C^2 + 4C^2
    biases_per_layer = 4 * 16 * C
    io_tile = 4 * rows * C
    act = 4 * rows * (3 * C + min(4 * C, 512) + 2 * C)
    need = (2 * (weights_per_layer + biases_per_layer)   # double-buffered
            + 4 * io_tile + io_tile + 2 * act + (4 << 20))
    cap = int(0.85 * _tpu_vmem_capacity())
    return int(min(max(need, 32 << 20), cap))


def _pick_batch_tile(B, N, target_rows=256):
    # Pack several batch elements per grid step so the matmul M dimension
    # approaches the MXU height (128 on v5e, 256 on v6e/v7x). Requires N % 8
    # so in-kernel row blocks stay sublane-aligned, and keeps >= 2 parallel
    # grid steps when B >= 2 so both v7x TensorCores get work.
    if N % 8 != 0 or N >= target_rows:
        return 1
    min_par = min(2, B)
    best = 1
    for cand in range(1, B + 1):
        if B % cand == 0 and cand * N <= target_rows and B // cand >= min_par:
            best = cand
    return best


def transformer_forward(x, params, num_heads):
    """Fused TransformerL forward: one pallas_call over grid (B/bt, L)."""
    B, N, C = x.shape
    L = params["ln1_w"].shape[0]
    assert C % num_heads == 0
    bt = _pick_batch_tile(B, N)
    grid = (B // bt, L)

    def wmap(b, l):   # per-layer stacked weights: follow the layer grid index
        return (l, 0, 0)

    def xmap(b, l):   # activations: constant over l (resident across layers)
        return (b, 0, 0)

    in_specs = [
        pl.BlockSpec((bt, N, C), xmap),                 # x
        pl.BlockSpec((None, 1, C), wmap),               # ln_1 weight
        pl.BlockSpec((None, 1, C), wmap),               # ln_1 bias
        pl.BlockSpec((None, C, 3 * C), wmap),           # in_proj^T (q-scale folded, bf16)
        pl.BlockSpec((None, 1, 3 * C), wmap),           # in_proj bias (q-scale folded)
        pl.BlockSpec((None, C, C), wmap),               # out_proj^T (bf16)
        pl.BlockSpec((None, 1, C), wmap),               # out_proj bias
        pl.BlockSpec((None, 1, C), wmap),               # ln_2 weight
        pl.BlockSpec((None, 1, C), wmap),               # ln_2 bias
        pl.BlockSpec((None, C, 4 * C), wmap),           # c_fc^T (bf16)
        pl.BlockSpec((None, 1, 4 * C), wmap),           # c_fc bias
        pl.BlockSpec((None, 4 * C, C), wmap),           # c_proj^T (bf16)
        pl.BlockSpec((None, 1, C), wmap),               # c_proj bias
    ]
    out_spec = pl.BlockSpec((bt, N, C), xmap)

    kernel = partial(fused_transformer_kernel, num_heads, bt, N, C)

    return pl.pallas_call(
        kernel,
        out_shape=jax.ShapeDtypeStruct((B, N, C), x.dtype),
        grid=grid,
        in_specs=in_specs,
        out_specs=out_spec,
        scratch_shapes=[pltpu.VMEM((bt * N, C), jnp.float32)],  # residual stream
        compiler_params=pltpu.CompilerParams(
            dimension_semantics=("parallel", "arbitrary"),
            vmem_limit_bytes=_vmem_limit_bytes(bt * N, C)),
    )(x, params["ln1_w"], params["ln1_b"], params["w_in_T"], params["b_in"],
      params["w_out_T"], params["b_out"], params["ln2_w"], params["ln2_b"],
      params["w_fc_T"], params["b_fc"], params["w_proj_T"], params["b_proj"])


def init_params(key, C, L, num_heads):
    """Per-layer parameters (PyTorch-style init), stacked over L, pre-transposed
    for x @ W^T, q-scale folded into the Q columns, matmul weights in bf16."""
    dh = C // num_heads
    scale = dh ** (-0.5)

    def xavier_uniform(k, shape):              # matches xavier_uniform_ for 2D
        fan_out, fan_in = shape
        a = math.sqrt(6.0 / (fan_in + fan_out))
        return jax.random.uniform(k, shape, jnp.float32, -a, a)

    def linear_weight(k, out_f, in_f):         # ~ PyTorch nn.Linear default init
        bound = 1.0 / math.sqrt(in_f)
        return jax.random.uniform(k, (out_f, in_f), jnp.float32, -bound, bound)

    def linear_bias(k, out_f, in_f):
        bound = 1.0 / math.sqrt(in_f)
        return jax.random.uniform(k, (out_f,), jnp.float32, -bound, bound)

    layers = []
    for lk in jax.random.split(key, L):
        ks = jax.random.split(lk, 6)
        in_w = xavier_uniform(ks[0], (3 * C, C))         # xavier_uniform_
        in_b = jnp.zeros((3 * C,), jnp.float32)          # constant_(0)
        out_w = linear_weight(ks[1], C, C)
        out_b = jnp.zeros((C,), jnp.float32)             # constant_(0)
        fc_w = linear_weight(ks[2], 4 * C, C)
        fc_b = linear_bias(ks[3], 4 * C, C)
        proj_w = linear_weight(ks[4], C, 4 * C)
        proj_b = linear_bias(ks[5], C, 4 * C)

        w_in_T = in_w.T                                   # (C, 3C); F.linear => x @ W^T
        w_in_T = w_in_T.at[:, :C].multiply(scale)         # fold q scale (exact math)
        b_in = in_b.at[:C].multiply(scale)

        layers.append({
            "ln1_w": jnp.ones((1, C), jnp.float32), "ln1_b": jnp.zeros((1, C), jnp.float32),
            "w_in_T": w_in_T.astype(jnp.bfloat16), "b_in": b_in[None, :],
            "w_out_T": out_w.T.astype(jnp.bfloat16), "b_out": out_b[None, :],
            "ln2_w": jnp.ones((1, C), jnp.float32), "ln2_b": jnp.zeros((1, C), jnp.float32),
            "w_fc_T": fc_w.T.astype(jnp.bfloat16), "b_fc": fc_b[None, :],
            "w_proj_T": proj_w.T.astype(jnp.bfloat16), "b_proj": proj_b[None, :],
        })
    return {k: jnp.stack([lp[k] for lp in layers]) for k in layers[0]}


def ref_forward(x, params, num_heads):
    # pure-JAX f32 reference mirroring the PyTorch math (q scale already folded
    # into the stored in_proj weights/bias), for self-validation.
    def ln(v, w, b, eps=1e-5):
        mu = v.mean(-1, keepdims=True)
        var = ((v - mu) ** 2).mean(-1, keepdims=True)
        return (v - mu) / jnp.sqrt(var + eps) * w + b

    B, N, C = x.shape
    L = params["ln1_w"].shape[0]
    dh = C // num_heads
    for l in range(L):
        w_in = params["w_in_T"][l].astype(jnp.float32)
        w_out = params["w_out_T"][l].astype(jnp.float32)
        w_fc = params["w_fc_T"][l].astype(jnp.float32)
        w_proj = params["w_proj_T"][l].astype(jnp.float32)
        h = ln(x, params["ln1_w"][l, 0], params["ln1_b"][l, 0])
        qkv = h @ w_in + params["b_in"][l, 0]
        qkv = qkv.reshape(B, N, 3, num_heads, dh).transpose(2, 0, 3, 1, 4)
        q, k, v = qkv[0], qkv[1], qkv[2]
        s = jnp.einsum('bhnd,bhmd->bhnm', q, k)
        a = jax.nn.softmax(s, -1)
        o = jnp.einsum('bhnm,bhmd->bhnd', a, v)
        o = o.transpose(0, 2, 1, 3).reshape(B, N, C)
        x = x + (o @ w_out + params["b_out"][l, 0])
        h2 = ln(x, params["ln2_w"][l, 0], params["ln2_b"][l, 0])
        fc = h2 @ w_fc + params["b_fc"][l, 0]
        g = fc * jax.nn.sigmoid(1.702 * fc)
        x = x + (g @ w_proj + params["b_proj"][l, 0])
    return x


if __name__ == "__main__":
    B, N, C, H, L = 4, 8, 32, 4, 2   # batch, seq, width, heads, layers
    key = jax.random.PRNGKey(0)
    kx, kp = jax.random.split(key)
    x = jax.random.normal(kx, (B, N, C), jnp.float32)
    params = init_params(kp, C, L, H)

    out = jax.block_until_ready(transformer_forward(x, params, H))

    ref = ref_forward(x, params, H)
    # bf16 MXU operands + EUP approx reciprocal in the kernel vs an f32
    # reference => relaxed tolerance (still tight enough to catch structural bugs).
    np.testing.assert_allclose(np.asarray(out), np.asarray(ref), rtol=5e-2, atol=5e-2)

    print("KERNEL_OK")
</pallas_src>

<mosaic_0001>
module attributes {stable_mosaic.version = 11 : i64} {
  func.func @fused_transformer_kernel(%arg0: i32, %arg1: i32, %arg2: memref<2x8x32xf32, #tpu.memory_space<vmem>>, %arg3: memref<1x1x32xf32, #tpu.memory_space<vmem>>, %arg4: memref<1x1x32xf32, #tpu.memory_space<vmem>>, %arg5: memref<1x32x96xbf16, #tpu.memory_space<vmem>>, %arg6: memref<1x1x96xf32, #tpu.memory_space<vmem>>, %arg7: memref<1x32x32xbf16, #tpu.memory_space<vmem>>, %arg8: memref<1x1x32xf32, #tpu.memory_space<vmem>>, %arg9: memref<1x1x32xf32, #tpu.memory_space<vmem>>, %arg10: memref<1x1x32xf32, #tpu.memory_space<vmem>>, %arg11: memref<1x32x128xbf16, #tpu.memory_space<vmem>>, %arg12: memref<1x1x128xf32, #tpu.memory_space<vmem>>, %arg13: memref<1x128x32xbf16, #tpu.memory_space<vmem>>, %arg14: memref<1x1x32xf32, #tpu.memory_space<vmem>>, %arg15: memref<2x8x32xf32, #tpu.memory_space<vmem>>, %arg16: memref<16x32xf32, #tpu.memory_space<vmem>>) attributes {dimension_semantics = [#tpu.dimension_semantics<parallel>, #tpu.dimension_semantics<arbitrary>], iteration_bounds = array<i64: 2, 2>, scalar_prefetch = 0 : i64, scratch_operands = 1 : i64, tpu.core_type = #tpu.core_type<tc>, window_params = [{transform_indices = @transform_0, window_bounds = array<i64: 2, 8, 32>}, {transform_indices = @transform_1, window_bounds = array<i64: 1, 1, 32>}, {transform_indices = @transform_2, window_bounds = array<i64: 1, 1, 32>}, {transform_indices = @transform_3, window_bounds = array<i64: 1, 32, 96>}, {transform_indices = @transform_4, window_bounds = array<i64: 1, 1, 96>}, {transform_indices = @transform_5, window_bounds = array<i64: 1, 32, 32>}, {transform_indices = @transform_6, window_bounds = array<i64: 1, 1, 32>}, {transform_indices = @transform_7, window_bounds = array<i64: 1, 1, 32>}, {transform_indices = @transform_8, window_bounds = array<i64: 1, 1, 32>}, {transform_indices = @transform_9, window_bounds = array<i64: 1, 32, 128>}, {transform_indices = @transform_10, window_bounds = array<i64: 1, 1, 128>}, {transform_indices = @transform_11, window_bounds = array<i64: 1, 128, 32>}, {transform_indices = @transform_12, window_bounds = array<i64: 1, 1, 32>}, {transform_indices = @transform_13, window_bounds = array<i64: 2, 8, 32>}]} {
    %c0_i32 = arith.constant 0 : i32
    %0 = arith.cmpi eq, %arg1, %c0_i32 : i32
    %1 = arith.extui %0 : i1 to i32
    %c0_i32_0 = arith.constant 0 : i32
    %2 = arith.cmpi ne, %1, %c0_i32_0 : i32
    scf.if %2 {
      %c0_115 = arith.constant 0 : index
      %c0_116 = arith.constant 0 : index
      %c0_117 = arith.constant 0 : index
      %270 = vector.load %arg2[%c0_115, %c0_116, %c0_117] : memref<2x8x32xf32, #tpu.memory_space<vmem>>, vector<1x8x32xf32>
      %271 = vector.shape_cast %270 : vector<1x8x32xf32> to vector<8x32xf32>
      %c0_118 = arith.constant 0 : index
      %c0_119 = arith.constant 0 : index
      %272 = vector.load %arg16[%c0_118, %c0_119] : memref<16x32xf32, #tpu.memory_space<vmem>>, vector<8x32xf32>
      tpu.vector_store %arg16[%c0_118, %c0_119], %271 {strides = array<i32>} : memref<16x32xf32, #tpu.memory_space<vmem>>, vector<8x32xf32>,
      %c1 = arith.constant 1 : index
      %c0_120 = arith.constant 0 : index
      %c0_121 = arith.constant 0 : index
      %273 = vector.load %arg2[%c1, %c0_120, %c0_121] : memref<2x8x32xf32, #tpu.memory_space<vmem>>, vector<1x8x32xf32>
      %274 = vector.shape_cast %273 : vector<1x8x32xf32> to vector<8x32xf32>
      %c8_122 = arith.constant 8 : index
      %c0_123 = arith.constant 0 : index
      %275 = vector.load %arg16[%c8_122, %c0_123] : memref<16x32xf32, #tpu.memory_space<vmem>>, vector<8x32xf32>
      tpu.vector_store %arg16[%c8_122, %c0_123], %274 {strides = array<i32>} : memref<16x32xf32, #tpu.memory_space<vmem>>, vector<8x32xf32>,
    } else {
    }
    %c0 = arith.constant 0 : index
    %c0_1 = arith.constant 0 : index
    %3 = vector.load %arg16[%c0, %c0_1] : memref<16x32xf32, #tpu.memory_space<vmem>>, vector<16x32xf32>
    %c0_2 = arith.constant 0 : index
    %c0_3 = arith.constant 0 : index
    %c0_4 = arith.constant 0 : index
    %4 = vector.load %arg3[%c0_2, %c0_3, %c0_4] : memref<1x1x32xf32, #tpu.memory_space<vmem>>, vector<1x1x32xf32>
    %5 = vector.shape_cast %4 : vector<1x1x32xf32> to vector<1x32xf32>
    %c0_5 = arith.constant 0 : index
    %c0_6 = arith.constant 0 : index
    %c0_7 = arith.constant 0 : index
    %6 = vector.load %arg4[%c0_5, %c0_6, %c0_7] : memref<1x1x32xf32, #tpu.memory_space<vmem>>, vector<1x1x32xf32>
    %7 = vector.shape_cast %6 : vector<1x1x32xf32> to vector<1x32xf32>
    %cst = arith.constant dense<0.000000e+00> : vector<16xf32>
    %8 = vector.multi_reduction <add>, %3, %cst [1] : vector<16x32xf32> to vector<16xf32>
    %9 = vector.shape_cast %8 : vector<16xf32> to vector<16x1xf32>
    %cst_8 = arith.constant 3.200000e+01 : f32
    %10 = vector.broadcast %cst_8 : f32 to vector<16x1xf32>
    %11 = arith.divf %9, %10 : vector<16x1xf32>
    %12 = vector.broadcast %11 : vector<16x1xf32> to vector<16x32xf32>
    %13 = arith.subf %3, %12 : vector<16x32xf32>
    %14 = arith.mulf %13, %13 : vector<16x32xf32>
    %cst_9 = arith.constant dense<0.000000e+00> : vector<16xf32>
    %15 = vector.multi_reduction <add>, %14, %cst_9 [1] : vector<16x32xf32> to vector<16xf32>
    %16 = vector.shape_cast %15 : vector<16xf32> to vector<16x1xf32>
    %cst_10 = arith.constant 3.200000e+01 : f32
    %17 = vector.broadcast %cst_10 : f32 to vector<16x1xf32>
    %18 = arith.divf %16, %17 : vector<16x1xf32>
    %19 = vector.broadcast %11 : vector<16x1xf32> to vector<16x32xf32>
    %20 = arith.subf %3, %19 : vector<16x32xf32>
    %cst_11 = arith.constant 9.99999974E-6 : f32
    %21 = vector.broadcast %cst_11 : f32 to vector<16x1xf32>
    %22 = arith.addf %18, %21 : vector<16x1xf32>
    %23 = math.rsqrt %22 : vector<16x1xf32>
    %24 = vector.broadcast %23 : vector<16x1xf32> to vector<16x32xf32>
    %25 = arith.mulf %20, %24 : vector<16x32xf32>
    %26 = vector.broadcast %5 : vector<1x32xf32> to vector<16x32xf32>
    %27 = arith.mulf %25, %26 : vector<16x32xf32>
    %28 = vector.broadcast %7 : vector<1x32xf32> to vector<16x32xf32>
    %29 = arith.addf %27, %28 : vector<16x32xf32>
    %30 = arith.truncf %29 : vector<16x32xf32> to vector<16x32xbf16>
    %c0_12 = arith.constant 0 : index
    %c0_13 = arith.constant 0 : index
    %c0_14 = arith.constant 0 : index
    %31 = vector.load %arg5[%c0_12, %c0_13, %c0_14] : memref<1x32x96xbf16, #tpu.memory_space<vmem>>, vector<1x32x96xbf16>
    %32 = vector.shape_cast %31 : vector<1x32x96xbf16> to vector<32x96xbf16>
    %cst_15 = arith.constant dense<0.000000e+00> : vector<16x96xf32>
    %33 = tpu.matmul %30, %32, %cst_15 {dimension_numbers = #tpu.dot_dimension_numbers<[1], [0], [0], [1], [0, 0, 1, 1], [], []>} : vector<16x32xbf16>, vector<32x96xbf16>, vector<16x96xf32> -> vector<16x96xf32>
    %c0_16 = arith.constant 0 : index
    %c0_17 = arith.constant 0 : index
    %c0_18 = arith.constant 0 : index
    %34 = vector.load %arg6[%c0_16, %c0_17, %c0_18] : memref<1x1x96xf32, #tpu.memory_space<vmem>>, vector<1x1x96xf32>
    %35 = vector.shape_cast %34 : vector<1x1x96xf32> to vector<1x96xf32>
    %36 = vector.broadcast %35 : vector<1x96xf32> to vector<16x96xf32>
    %37 = arith.addf %33, %36 : vector<16x96xf32>
    %38 = arith.truncf %37 : vector<16x96xf32> to vector<16x96xbf16>
    %cst_19 = arith.constant 0.000000e+00 : f32
    %39 = vector.broadcast %cst_19 : f32 to vector<8x32xf32>
    %40 = vector.extract_strided_slice %38 {offsets = [0, 0], sizes = [8, 8], strides = [1, 1]} : vector<16x96xbf16> to vector<8x8xbf16>
    %41 = vector.extract_strided_slice %38 {offsets = [0, 32], sizes = [8, 8], strides = [1, 1]} : vector<16x96xbf16> to vector<8x8xbf16>
    %42 = vector.extract_strided_slice %38 {offsets = [0, 64], sizes = [8, 8], strides = [1, 1]} : vector<16x96xbf16> to vector<8x8xbf16>
    %cst_20 = arith.constant dense<0.000000e+00> : vector<8x8xf32>
    %43 = tpu.matmul %40, %41, %cst_20 {dimension_numbers = #tpu.dot_dimension_numbers<[1], [1], [0], [0], [0, 0, 1, 0], [], []>} : vector<8x8xbf16>, vector<8x8xbf16>, vector<8x8xf32> -> vector<8x8xf32>
    %cst_21 = arith.constant dense<0xFF800000> : vector<8xf32>
    %44 = vector.multi_reduction <maximumf>, %43, %cst_21 [1] : vector<8x8xf32> to vector<8xf32>
    %45 = vector.shape_cast %44 : vector<8xf32> to vector<8x1xf32>
    %46 = vector.broadcast %45 : vector<8x1xf32> to vector<8x8xf32>
    %47 = arith.subf %43, %46 : vector<8x8xf32>
    %48 = math.exp %47 : vector<8x8xf32>
    %cst_22 = arith.constant dense<0.000000e+00> : vector<8xf32>
    %49 = vector.multi_reduction <add>, %48, %cst_22 [1] : vector<8x8xf32> to vector<8xf32>
    %50 = vector.shape_cast %49 : vector<8xf32> to vector<8x1xf32>
    %51 = tpu.reciprocal %50 {approx = true} : vector<8x1xf32> -> vector<8x1xf32>
    %52 = vector.broadcast %51 : vector<8x1xf32> to vector<8x8xf32>
    %53 = arith.mulf %48, %52 : vector<8x8xf32>
    %54 = arith.truncf %53 : vector<8x8xf32> to vector<8x8xbf16>
    %cst_23 = arith.constant dense<0.000000e+00> : vector<8x8xf32>
    %55 = tpu.matmul %54, %42, %cst_23 {dimension_numbers = #tpu.dot_dimension_numbers<[1], [0], [0], [1], [0, 0, 1, 1], [], []>} : vector<8x8xbf16>, vector<8x8xbf16>, vector<8x8xf32> -> vector<8x8xf32>
    %56 = arith.truncf %55 : vector<8x8xf32> to vector<8x8xbf16>
    %c0_24 = arith.constant 0 : index
    %c0_25 = arith.constant 0 : index
    %c0_26 = arith.constant 0 : index
    %57 = vector.load %arg7[%c0_24, %c0_25, %c0_26] : memref<1x32x32xbf16, #tpu.memory_space<vmem>>, vector<1x8x32xbf16>
    %58 = vector.shape_cast %57 : vector<1x8x32xbf16> to vector<8x32xbf16>
    %cst_27 = arith.constant dense<0.000000e+00> : vector<8x32xf32>
    %59 = tpu.matmul %56, %58, %cst_27 {dimension_numbers = #tpu.dot_dimension_numbers<[1], [0], [0], [1], [0, 0, 1, 1], [], []>} : vector<8x8xbf16>, vector<8x32xbf16>, vector<8x32xf32> -> vector<8x32xf32>
    %60 = arith.addf %39, %59 : vector<8x32xf32>
    %61 = vector.extract_strided_slice %38 {offsets = [0, 8], sizes = [8, 8], strides = [1, 1]} : vector<16x96xbf16> to vector<8x8xbf16>
    %62 = vector.extract_strided_slice %38 {offsets = [0, 40], sizes = [8, 8], strides = [1, 1]} : vector<16x96xbf16> to vector<8x8xbf16>
    %63 = vector.extract_strided_slice %38 {offsets = [0, 72], sizes = [8, 8], strides = [1, 1]} : vector<16x96xbf16> to vector<8x8xbf16>
    %cst_28 = arith.constant dense<0.000000e+00> : vector<8x8xf32>
    %64 = tpu.matmul %61, %62, %cst_28 {dimension_numbers = #tpu.dot_dimension_numbers<[1], [1], [0], [0], [0, 0, 1, 0], [], []>} : vector<8x8xbf16>, vector<8x8xbf16>, vector<8x8xf32> -> vector<8x8xf32>
    %cst_29 = arith.constant dense<0xFF800000> : vector<8xf32>
    %65 = vector.multi_reduction <maximumf>, %64, %cst_29 [1] : vector<8x8xf32> to vector<8xf32>
    %66 = vector.shape_cast %65 : vector<8xf32> to vector<8x1xf32>
    %67 = vector.broadcast %66 : vector<8x1xf32> to vector<8x8xf32>
    %68 = arith.subf %64, %67 : vector<8x8xf32>
    %69 = math.exp %68 : vector<8x8xf32>
    %cst_30 = arith.constant dense<0.000000e+00> : vector<8xf32>
    %70 = vector.multi_reduction <add>, %69, %cst_30 [1] : vector<8x8xf32> to vector<8xf32>
    %71 = vector.shape_cast %70 : vector<8xf32> to vector<8x1xf32>
    %72 = tpu.reciprocal %71 {approx = true} : vector<8x1xf32> -> vector<8x1xf32>
    %73 = vector.broadcast %72 : vector<8x1xf32> to vector<8x8xf32>
    %74 = arith.mulf %69, %73 : vector<8x8xf32>
    %75 = arith.truncf %74 : vector<8x8xf32> to vector<8x8xbf16>
    %cst_31 = arith.constant dense<0.000000e+00> : vector<8x8xf32>
    %76 = tpu.matmul %75, %63, %cst_31 {dimension_numbers = #tpu.dot_dimension_numbers<[1], [0], [0], [1], [0, 0, 1, 1], [], []>} : vector<8x8xbf16>, vector<8x8xbf16>, vector<8x8xf32> -> vector<8x8xf32>
    %77 = arith.truncf %76 : vector<8x8xf32> to vector<8x8xbf16>
    %c0_32 = arith.constant 0 : index
    %c8 = arith.constant 8 : index
    %c0_33 = arith.constant 0 : index
    %78 = vector.load %arg7[%c0_32, %c8, %c0_33] : memref<1x32x32xbf16, #tpu.memory_space<vmem>>, vector<1x8x32xbf16>
    %79 = vector.shape_cast %78 : vector<1x8x32xbf16> to vector<8x32xbf16>
    %cst_34 = arith.constant dense<0.000000e+00> : vector<8x32xf32>
    %80 = tpu.matmul %77, %79, %cst_34 {dimension_numbers = #tpu.dot_dimension_numbers<[1], [0], [0], [1], [0, 0, 1, 1], [], []>} : vector<8x8xbf16>, vector<8x32xbf16>, vector<8x32xf32> -> vector<8x32xf32>
    %81 = arith.addf %60, %80 : vector<8x32xf32>
    %82 = vector.extract_strided_slice %38 {offsets = [0, 16], sizes = [8, 8], strides = [1, 1]} : vector<16x96xbf16> to vector<8x8xbf16>
    %83 = vector.extract_strided_slice %38 {offsets = [0, 48], sizes = [8, 8], strides = [1, 1]} : vector<16x96xbf16> to vector<8x8xbf16>
    %84 = vector.extract_strided_slice %38 {offsets = [0, 80], sizes = [8, 8], strides = [1, 1]} : vector<16x96xbf16> to vector<8x8xbf16>
    %cst_35 = arith.constant dense<0.000000e+00> : vector<8x8xf32>
    %85 = tpu.matmul %82, %83, %cst_35 {dimension_numbers = #tpu.dot_dimension_numbers<[1], [1], [0], [0], [0, 0, 1, 0], [], []>} : vector<8x8xbf16>, vector<8x8xbf16>, vector<8x8xf32> -> vector<8x8xf32>
    %cst_36 = arith.constant dense<0xFF800000> : vector<8xf32>
    %86 = vector.multi_reduction <maximumf>, %85, %cst_36 [1] : vector<8x8xf32> to vector<8xf32>
    %87 = vector.shape_cast %86 : vector<8xf32> to vector<8x1xf32>
    %88 = vector.broadcast %87 : vector<8x1xf32> to vector<8x8xf32>
    %89 = arith.subf %85, %88 : vector<8x8xf32>
    %90 = math.exp %89 : vector<8x8xf32>
    %cst_37 = arith.constant dense<0.000000e+00> : vector<8xf32>
    %91 = vector.multi_reduction <add>, %90, %cst_37 [1] : vector<8x8xf32> to vector<8xf32>
    %92 = vector.shape_cast %91 : vector<8xf32> to vector<8x1xf32>
    %93 = tpu.reciprocal %92 {approx = true} : vector<8x1xf32> -> vector<8x1xf32>
    %94 = vector.broadcast %93 : vector<8x1xf32> to vector<8x8xf32>
    %95 = arith.mulf %90, %94 : vector<8x8xf32>
    %96 = arith.truncf %95 : vector<8x8xf32> to vector<8x8xbf16>
    %cst_38 = arith.constant dense<0.000000e+00> : vector<8x8xf32>
    %97 = tpu.matmul %96, %84, %cst_38 {dimension_numbers = #tpu.dot_dimension_numbers<[1], [0], [0], [1], [0, 0, 1, 1], [], []>} : vector<8x8xbf16>, vector<8x8xbf16>, vector<8x8xf32> -> vector<8x8xf32>
    %98 = arith.truncf %97 : vector<8x8xf32> to vector<8x8xbf16>
    %c0_39 = arith.constant 0 : index
    %c16 = arith.constant 16 : index
    %c0_40 = arith.constant 0 : index
    %99 = vector.load %arg7[%c0_39, %c16, %c0_40] : memref<1x32x32xbf16, #tpu.memory_space<vmem>>, vector<1x8x32xbf16>
    %100 = vector.shape_cast %99 : vector<1x8x32xbf16> to vector<8x32xbf16>
    %cst_41 = arith.constant dense<0.000000e+00> : vector<8x32xf32>
    %101 = tpu.matmul %98, %100, %cst_41 {dimension_numbers = #tpu.dot_dimension_numbers<[1], [0], [0], [1], [0, 0, 1, 1], [], []>} : vector<8x8xbf16>, vector<8x32xbf16>, vector<8x32xf32> -> vector<8x32xf32>
    %102 = arith.addf %81, %101 : vector<8x32xf32>
    %103 = vector.extract_strided_slice %38 {offsets = [0, 24], sizes = [8, 8], strides = [1, 1]} : vector<16x96xbf16> to vector<8x8xbf16>
    %104 = vector.extract_strided_slice %38 {offsets = [0, 56], sizes = [8, 8], strides = [1, 1]} : vector<16x96xbf16> to vector<8x8xbf16>
    %105 = vector.extract_strided_slice %38 {offsets = [0, 88], sizes = [8, 8], strides = [1, 1]} : vector<16x96xbf16> to vector<8x8xbf16>
    %cst_42 = arith.constant dense<0.000000e+00> : vector<8x8xf32>
    %106 = tpu.matmul %103, %104, %cst_42 {dimension_numbers = #tpu.dot_dimension_numbers<[1], [1], [0], [0], [0, 0, 1, 0], [], []>} : vector<8x8xbf16>, vector<8x8xbf16>, vector<8x8xf32> -> vector<8x8xf32>
    %cst_43 = arith.constant dense<0xFF800000> : vector<8xf32>
    %107 = vector.multi_reduction <maximumf>, %106, %cst_43 [1] : vector<8x8xf32> to vector<8xf32>
    %108 = vector.shape_cast %107 : vector<8xf32> to vector<8x1xf32>
    %109 = vector.broadcast %108 : vector<8x1xf32> to vector<8x8xf32>
    %110 = arith.subf %106, %109 : vector<8x8xf32>
    %111 = math.exp %110 : vector<8x8xf32>
    %cst_44 = arith.constant dense<0.000000e+00> : vector<8xf32>
    %112 = vector.multi_reduction <add>, %111, %cst_44 [1] : vector<8x8xf32> to vector<8xf32>
    %113 = vector.shape_cast %112 : vector<8xf32> to vector<8x1xf32>
    %114 = tpu.reciprocal %113 {approx = true} : vector<8x1xf32> -> vector<8x1xf32>
    %115 = vector.broadcast %114 : vector<8x1xf32> to vector<8x8xf32>
    %116 = arith.mulf %111, %115 : vector<8x8xf32>
    %117 = arith.truncf %116 : vector<8x8xf32> to vector<8x8xbf16>
    %cst_45 = arith.constant dense<0.000000e+00> : vector<8x8xf32>
    %118 = tpu.matmul %117, %105, %cst_45 {dimension_numbers = #tpu.dot_dimension_numbers<[1], [0], [0], [1], [0, 0, 1, 1], [], []>} : vector<8x8xbf16>, vector<8x8xbf16>, vector<8x8xf32> -> vector<8x8xf32>
    %119 = arith.truncf %118 : vector<8x8xf32> to vector<8x8xbf16>
    %c0_46 = arith.constant 0 : index
    %c24 = arith.constant 24 : index
    %c0_47 = arith.constant 0 : index
    %120 = vector.load %arg7[%c0_46, %c24, %c0_47] : memref<1x32x32xbf16, #tpu.memory_space<vmem>>, vector<1x8x32xbf16>
    %121 = vector.shape_cast %120 : vector<1x8x32xbf16> to vector<8x32xbf16>
    %cst_48 = arith.constant dense<0.000000e+00> : vector<8x32xf32>
    %122 = tpu.matmul %119, %121, %cst_48 {dimension_numbers = #tpu.dot_dimension_numbers<[1], [0], [0], [1], [0, 0, 1, 1], [], []>} : vector<8x8xbf16>, vector<8x32xbf16>, vector<8x32xf32> -> vector<8x32xf32>
    %123 = arith.addf %102, %122 : vector<8x32xf32>
    %cst_49 = arith.constant 0.000000e+00 : f32
    %124 = vector.broadcast %cst_49 : f32 to vector<8x32xf32>
    %125 = vector.extract_strided_slice %38 {offsets = [8, 0], sizes = [8, 8], strides = [1, 1]} : vector<16x96xbf16> to vector<8x8xbf16>
    %126 = vector.extract_strided_slice %38 {offsets = [8, 32], sizes = [8, 8], strides = [1, 1]} : vector<16x96xbf16> to vector<8x8xbf16>
    %127 = vector.extract_strided_slice %38 {offsets = [8, 64], sizes = [8, 8], strides = [1, 1]} : vector<16x96xbf16> to vector<8x8xbf16>
    %cst_50 = arith.constant dense<0.000000e+00> : vector<8x8xf32>
    %128 = tpu.matmul %125, %126, %cst_50 {dimension_numbers = #tpu.dot_dimension_numbers<[1], [1], [0], [0], [0, 0, 1, 0], [], []>} : vector<8x8xbf16>, vector<8x8xbf16>, vector<8x8xf32> -> vector<8x8xf32>
    %cst_51 = arith.constant dense<0xFF800000> : vector<8xf32>
    %129 = vector.multi_reduction <maximumf>, %128, %cst_51 [1] : vector<8x8xf32> to vector<8xf32>
    %130 = vector.shape_cast %129 : vector<8xf32> to vector<8x1xf32>
    %131 = vector.broadcast %130 : vector<8x1xf32> to vector<8x8xf32>
    %132 = arith.subf %128, %131 : vector<8x8xf32>
    %133 = math.exp %132 : vector<8x8xf32>
    %cst_52 = arith.constant dense<0.000000e+00> : vector<8xf32>
    %134 = vector.multi_reduction <add>, %133, %cst_52 [1] : vector<8x8xf32> to vector<8xf32>
    %135 = vector.shape_cast %134 : vector<8xf32> to vector<8x1xf32>
    %136 = tpu.reciprocal %135 {approx = true} : vector<8x1xf32> -> vector<8x1xf32>
    %137 = vector.broadcast %136 : vector<8x1xf32> to vector<8x8xf32>
    %138 = arith.mulf %133, %137 : vector<8x8xf32>
    %139 = arith.truncf %138 : vector<8x8xf32> to vector<8x8xbf16>
    %cst_53 = arith.constant dense<0.000000e+00> : vector<8x8xf32>
    %140 = tpu.matmul %139, %127, %cst_53 {dimension_numbers = #tpu.dot_dimension_numbers<[1], [0], [0], [1], [0, 0, 1, 1], [], []>} : vector<8x8xbf16>, vector<8x8xbf16>, vector<8x8xf32> -> vector<8x8xf32>
    %141 = arith.truncf %140 : vector<8x8xf32> to vector<8x8xbf16>
    %c0_54 = arith.constant 0 : index
    %c0_55 = arith.constant 0 : index
    %c0_56 = arith.constant 0 : index
    %142 = vector.load %arg7[%c0_54, %c0_55, %c0_56] : memref<1x32x32xbf16, #tpu.memory_space<vmem>>, vector<1x8x32xbf16>
    %143 = vector.shape_cast %142 : vector<1x8x32xbf16> to vector<8x32xbf16>
    %cst_57 = arith.constant dense<0.000000e+00> : vector<8x32xf32>
    %144 = tpu.matmul %141, %143, %cst_57 {dimension_numbers = #tpu.dot_dimension_numbers<[1], [0], [0], [1], [0, 0, 1, 1], [], []>} : vector<8x8xbf16>, vector<8x32xbf16>, vector<8x32xf32> -> vector<8x32xf32>
    %145 = arith.addf %124, %144 : vector<8x32xf32>
    %146 = vector.extract_strided_slice %38 {offsets = [8, 8], sizes = [8, 8], strides = [1, 1]} : vector<16x96xbf16> to vector<8x8xbf16>
    %147 = vector.extract_strided_slice %38 {offsets = [8, 40], sizes = [8, 8], strides = [1, 1]} : vector<16x96xbf16> to vector<8x8xbf16>
    %148 = vector.extract_strided_slice %38 {offsets = [8, 72], sizes = [8, 8], strides = [1, 1]} : vector<16x96xbf16> to vector<8x8xbf16>
    %cst_58 = arith.constant dense<0.000000e+00> : vector<8x8xf32>
    %149 = tpu.matmul %146, %147, %cst_58 {dimension_numbers = #tpu.dot_dimension_numbers<[1], [1], [0], [0], [0, 0, 1, 0], [], []>} : vector<8x8xbf16>, vector<8x8xbf16>, vector<8x8xf32> -> vector<8x8xf32>
    %cst_59 = arith.constant dense<0xFF800000> : vector<8xf32>
    %150 = vector.multi_reduction <maximumf>, %149, %cst_59 [1] : vector<8x8xf32> to vector<8xf32>
    %151 = vector.shape_cast %150 : vector<8xf32> to vector<8x1xf32>
    %152 = vector.broadcast %151 : vector<8x1xf32> to vector<8x8xf32>
    %153 = arith.subf %149, %152 : vector<8x8xf32>
    %154 = math.exp %153 : vector<8x8xf32>
    %cst_60 = arith.constant dense<0.000000e+00> : vector<8xf32>
    %155 = vector.multi_reduction <add>, %154, %cst_60 [1] : vector<8x8xf32> to vector<8xf32>
    %156 = vector.shape_cast %155 : vector<8xf32> to vector<8x1xf32>
    %157 = tpu.reciprocal %156 {approx = true} : vector<8x1xf32> -> vector<8x1xf32>
    %158 = vector.broadcast %157 : vector<8x1xf32> to vector<8x8xf32>
    %159 = arith.mulf %154, %158 : vector<8x8xf32>
    %160 = arith.truncf %159 : vector<8x8xf32> to vector<8x8xbf16>
    %cst_61 = arith.constant dense<0.000000e+00> : vector<8x8xf32>
    %161 = tpu.matmul %160, %148, %cst_61 {dimension_numbers = #tpu.dot_dimension_numbers<[1], [0], [0], [1], [0, 0, 1, 1], [], []>} : vector<8x8xbf16>, vector<8x8xbf16>, vector<8x8xf32> -> vector<8x8xf32>
    %162 = arith.truncf %161 : vector<8x8xf32> to vector<8x8xbf16>
    %c0_62 = arith.constant 0 : index
    %c8_63 = arith.constant 8 : index
    %c0_64 = arith.constant 0 : index
    %163 = vector.load %arg7[%c0_62, %c8_63, %c0_64] : memref<1x32x32xbf16, #tpu.memory_space<vmem>>, vector<1x8x32xbf16>
    %164 = vector.shape_cast %163 : vector<1x8x32xbf16> to vector<8x32xbf16>
    %cst_65 = arith.constant dense<0.000000e+00> : vector<8x32xf32>
    %165 = tpu.matmul %162, %164, %cst_65 {dimension_numbers = #tpu.dot_dimension_numbers<[1], [0], [0], [1], [0, 0, 1, 1], [], []>} : vector<8x8xbf16>, vector<8x32xbf16>, vector<8x32xf32> -> vector<8x32xf32>
    %166 = arith.addf %145, %165 : vector<8x32xf32>
    %167 = vector.extract_strided_slice %38 {offsets = [8, 16], sizes = [8, 8], strides = [1, 1]} : vector<16x96xbf16> to vector<8x8xbf16>
    %168 = vector.extract_strided_slice %38 {offsets = [8, 48], sizes = [8, 8], strides = [1, 1]} : vector<16x96xbf16> to vector<8x8xbf16>
    %169 = vector.extract_strided_slice %38 {offsets = [8, 80], sizes = [8, 8], strides = [1, 1]} : vector<16x96xbf16> to vector<8x8xbf16>
    %cst_66 = arith.constant dense<0.000000e+00> : vector<8x8xf32>
    %170 = tpu.matmul %167, %168, %cst_66 {dimension_numbers = #tpu.dot_dimension_numbers<[1], [1], [0], [0], [0, 0, 1, 0], [], []>} : vector<8x8xbf16>, vector<8x8xbf16>, vector<8x8xf32> -> vector<8x8xf32>
    %cst_67 = arith.constant dense<0xFF800000> : vector<8xf32>
    %171 = vector.multi_reduction <maximumf>, %170, %cst_67 [1] : vector<8x8xf32> to vector<8xf32>
    %172 = vector.shape_cast %171 : vector<8xf32> to vector<8x1xf32>
    %173 = vector.broadcast %172 : vector<8x1xf32> to vector<8x8xf32>
    %174 = arith.subf %170, %173 : vector<8x8xf32>
    %175 = math.exp %174 : vector<8x8xf32>
    %cst_68 = arith.constant dense<0.000000e+00> : vector<8xf32>
    %176 = vector.multi_reduction <add>, %175, %cst_68 [1] : vector<8x8xf32> to vector<8xf32>
    %177 = vector.shape_cast %176 : vector<8xf32> to vector<8x1xf32>
    %178 = tpu.reciprocal %177 {approx = true} : vector<8x1xf32> -> vector<8x1xf32>
    %179 = vector.broadcast %178 : vector<8x1xf32> to vector<8x8xf32>
    %180 = arith.mulf %175, %179 : vector<8x8xf32>
    %181 = arith.truncf %180 : vector<8x8xf32> to vector<8x8xbf16>
    %cst_69 = arith.constant dense<0.000000e+00> : vector<8x8xf32>
    %182 = tpu.matmul %181, %169, %cst_69 {dimension_numbers = #tpu.dot_dimension_numbers<[1], [0], [0], [1], [0, 0, 1, 1], [], []>} : vector<8x8xbf16>, vector<8x8xbf16>, vector<8x8xf32> -> vector<8x8xf32>
    %183 = arith.truncf %182 : vector<8x8xf32> to vector<8x8xbf16>
    %c0_70 = arith.constant 0 : index
    %c16_71 = arith.constant 16 : index
    %c0_72 = arith.constant 0 : index
    %184 = vector.load %arg7[%c0_70, %c16_71, %c0_72] : memref<1x32x32xbf16, #tpu.memory_space<vmem>>, vector<1x8x32xbf16>
    %185 = vector.shape_cast %184 : vector<1x8x32xbf16> to vector<8x32xbf16>
    %cst_73 = arith.constant dense<0.000000e+00> : vector<8x32xf32>
    %186 = tpu.matmul %183, %185, %cst_73 {dimension_numbers = #tpu.dot_dimension_numbers<[1], [0], [0], [1], [0, 0, 1, 1], [], []>} : vector<8x8xbf16>, vector<8x32xbf16>, vector<8x32xf32> -> vector<8x32xf32>
    %187 = arith.addf %166, %186 : vector<8x32xf32>
    %188 = vector.extract_strided_slice %38 {offsets = [8, 24], sizes = [8, 8], strides = [1, 1]} : vector<16x96xbf16> to vector<8x8xbf16>
    %189 = vector.extract_strided_slice %38 {offsets = [8, 56], sizes = [8, 8], strides = [1, 1]} : vector<16x96xbf16> to vector<8x8xbf16>
    %190 = vector.extract_strided_slice %38 {offsets = [8, 88], sizes = [8, 8], strides = [1, 1]} : vector<16x96xbf16> to vector<8x8xbf16>
    %cst_74 = arith.constant dense<0.000000e+00> : vector<8x8xf32>
    %191 = tpu.matmul %188, %189, %cst_74 {dimension_numbers = #tpu.dot_dimension_numbers<[1], [1], [0], [0], [0, 0, 1, 0], [], []>} : vector<8x8xbf16>, vector<8x8xbf16>, vector<8x8xf32> -> vector<8x8xf32>
    %cst_75 = arith.constant dense<0xFF800000> : vector<8xf32>
    %192 = vector.multi_reduction <maximumf>, %191, %cst_75 [1] : vector<8x8xf32> to vector<8xf32>
    %193 = vector.shape_cast %192 : vector<8xf32> to vector<8x1xf32>
    %194 = vector.broadcast %193 : vector<8x1xf32> to vector<8x8xf32>
    %195 = arith.subf %191, %194 : vector<8x8xf32>
    %196 = math.exp %195 : vector<8x8xf32>
    %cst_76 = arith.constant dense<0.000000e+00> : vector<8xf32>
    %197 = vector.multi_reduction <add>, %196, %cst_76 [1] : vector<8x8xf32> to vector<8xf32>
    %198 = vector.shape_cast %197 : vector<8xf32> to vector<8x1xf32>
    %199 = tpu.reciprocal %198 {approx = true} : vector<8x1xf32> -> vector<8x1xf32>
    %200 = vector.broadcast %199 : vector<8x1xf32> to vector<8x8xf32>
    %201 = arith.mulf %196, %200 : vector<8x8xf32>
    %202 = arith.truncf %201 : vector<8x8xf32> to vector<8x8xbf16>
    %cst_77 = arith.constant dense<0.000000e+00> : vector<8x8xf32>
    %203 = tpu.matmul %202, %190, %cst_77 {dimension_numbers = #tpu.dot_dimension_numbers<[1], [0], [0], [1], [0, 0, 1, 1], [], []>} : vector<8x8xbf16>, vector<8x8xbf16>, vector<8x8xf32> -> vector<8x8xf32>
    %204 = arith.truncf %203 : vector<8x8xf32> to vector<8x8xbf16>
    %c0_78 = arith.constant 0 : index
    %c24_79 = arith.constant 24 : index
    %c0_80 = arith.constant 0 : index
    %205 = vector.load %arg7[%c0_78, %c24_79, %c0_80] : memref<1x32x32xbf16, #tpu.memory_space<vmem>>, vector<1x8x32xbf16>
    %206 = vector.shape_cast %205 : vector<1x8x32xbf16> to vector<8x32xbf16>
    %cst_81 = arith.constant dense<0.000000e+00> : vector<8x32xf32>
    %207 = tpu.matmul %204, %206, %cst_81 {dimension_numbers = #tpu.dot_dimension_numbers<[1], [0], [0], [1], [0, 0, 1, 1], [], []>} : vector<8x8xbf16>, vector<8x32xbf16>, vector<8x32xf32> -> vector<8x32xf32>
    %208 = arith.addf %187, %207 : vector<8x32xf32>
    %209 = tpu.concatenate %123, %208 in 0 : vector<8x32xf32>, vector<8x32xf32> -> vector<16x32xf32>
    %210 = arith.addf %3, %209 : vector<16x32xf32>
    %c0_82 = arith.constant 0 : index
    %c0_83 = arith.constant 0 : index
    %c0_84 = arith.constant 0 : index
    %211 = vector.load %arg8[%c0_82, %c0_83, %c0_84] : memref<1x1x32xf32, #tpu.memory_space<vmem>>, vector<1x1x32xf32>
    %212 = vector.shape_cast %211 : vector<1x1x32xf32> to vector<1x32xf32>
    %213 = vector.broadcast %212 : vector<1x32xf32> to vector<16x32xf32>
    %214 = arith.addf %210, %213 : vector<16x32xf32>
    %c0_85 = arith.constant 0 : index
    %c0_86 = arith.constant 0 : index
    %c0_87 = arith.constant 0 : index
    %215 = vector.load %arg9[%c0_85, %c0_86, %c0_87] : memref<1x1x32xf32, #tpu.memory_space<vmem>>, vector<1x1x32xf32>
    %216 = vector.shape_cast %215 : vector<1x1x32xf32> to vector<1x32xf32>
    %c0_88 = arith.constant 0 : index
    %c0_89 = arith.constant 0 : index
    %c0_90 = arith.constant 0 : index
    %217 = vector.load %arg10[%c0_88, %c0_89, %c0_90] : memref<1x1x32xf32, #tpu.memory_space<vmem>>, vector<1x1x32xf32>
    %218 = vector.shape_cast %217 : vector<1x1x32xf32> to vector<1x32xf32>
    %cst_91 = arith.constant dense<0.000000e+00> : vector<16xf32>
    %219 = vector.multi_reduction <add>, %214, %cst_91 [1] : vector<16x32xf32> to vector<16xf32>
    %220 = vector.shape_cast %219 : vector<16xf32> to vector<16x1xf32>
    %cst_92 = arith.constant 3.200000e+01 : f32
    %221 = vector.broadcast %cst_92 : f32 to vector<16x1xf32>
    %222 = arith.divf %220, %221 : vector<16x1xf32>
    %223 = vector.broadcast %222 : vector<16x1xf32> to vector<16x32xf32>
    %224 = arith.subf %214, %223 : vector<16x32xf32>
    %225 = arith.mulf %224, %224 : vector<16x32xf32>
    %cst_93 = arith.constant dense<0.000000e+00> : vector<16xf32>
    %226 = vector.multi_reduction <add>, %225, %cst_93 [1] : vector<16x32xf32> to vector<16xf32>
    %227 = vector.shape_cast %226 : vector<16xf32> to vector<16x1xf32>
    %cst_94 = arith.constant 3.200000e+01 : f32
    %228 = vector.broadcast %cst_94 : f32 to vector<16x1xf32>
    %229 = arith.divf %227, %228 : vector<16x1xf32>
    %230 = vector.broadcast %222 : vector<16x1xf32> to vector<16x32xf32>
    %231 = arith.subf %214, %230 : vector<16x32xf32>
    %cst_95 = arith.constant 9.99999974E-6 : f32
    %232 = vector.broadcast %cst_95 : f32 to vector<16x1xf32>
    %233 = arith.addf %229, %232 : vector<16x1xf32>
    %234 = math.rsqrt %233 : vector<16x1xf32>
    %235 = vector.broadcast %234 : vector<16x1xf32> to vector<16x32xf32>
    %236 = arith.mulf %231, %235 : vector<16x32xf32>
    %237 = vector.broadcast %216 : vector<1x32xf32> to vector<16x32xf32>
    %238 = arith.mulf %236, %237 : vector<16x32xf32>
    %239 = vector.broadcast %218 : vector<1x32xf32> to vector<16x32xf32>
    %240 = arith.addf %238, %239 : vector<16x32xf32>
    %241 = arith.truncf %240 : vector<16x32xf32> to vector<16x32xbf16>
    %c0_96 = arith.constant 0 : index
    %c0_97 = arith.constant 0 : index
    %c0_98 = arith.constant 0 : index
    %242 = vector.load %arg11[%c0_96, %c0_97, %c0_98] : memref<1x32x128xbf16, #tpu.memory_space<vmem>>, vector<1x32x128xbf16>
    %243 = vector.shape_cast %242 : vector<1x32x128xbf16> to vector<32x128xbf16>
    %cst_99 = arith.constant dense<0.000000e+00> : vector<16x128xf32>
    %244 = tpu.matmul %241, %243, %cst_99 {dimension_numbers = #tpu.dot_dimension_numbers<[1], [0], [0], [1], [0, 0, 1, 1], [], []>} : vector<16x32xbf16>, vector<32x128xbf16>, vector<16x128xf32> -> vector<16x128xf32>
    %c0_100 = arith.constant 0 : index
    %c0_101 = arith.constant 0 : index
    %c0_102 = arith.constant 0 : index
    %245 = vector.load %arg12[%c0_100, %c0_101, %c0_102] : memref<1x1x128xf32, #tpu.memory_space<vmem>>, vector<1x1x128xf32>
    %246 = vector.shape_cast %245 : vector<1x1x128xf32> to vector<1x128xf32>
    %247 = vector.broadcast %246 : vector<1x128xf32> to vector<16x128xf32>
    %248 = arith.addf %244, %247 : vector<16x128xf32>
    %cst_103 = arith.constant 1.702000e+00 : f32
    %249 = vector.broadcast %cst_103 : f32 to vector<16x128xf32>
    %250 = arith.mulf %249, %248 : vector<16x128xf32>
    %251 = arith.negf %250 : vector<16x128xf32>
    %252 = math.exp %251 : vector<16x128xf32>
    %cst_104 = arith.constant 1.000000e+00 : f32
    %253 = vector.broadcast %cst_104 : f32 to vector<16x128xf32>
    %254 = arith.addf %253, %252 : vector<16x128xf32>
    %255 = arith.divf %253, %254 : vector<16x128xf32>
    %256 = arith.mulf %248, %255 : vector<16x128xf32>
    %257 = arith.truncf %256 : vector<16x128xf32> to vector<16x128xbf16>
    %c0_105 = arith.constant 0 : index
    %c0_106 = arith.constant 0 : index
    %c0_107 = arith.constant 0 : index
    %258 = vector.load %arg13[%c0_105, %c0_106, %c0_107] : memref<1x128x32xbf16, #tpu.memory_space<vmem>>, vector<1x128x32xbf16>
    %259 = vector.shape_cast %258 : vector<1x128x32xbf16> to vector<128x32xbf16>
    %cst_108 = arith.constant dense<0.000000e+00> : vector<16x32xf32>
    %260 = tpu.matmul %257, %259, %cst_108 {dimension_numbers = #tpu.dot_dimension_numbers<[1], [0], [0], [1], [0, 0, 1, 1], [], []>} : vector<16x128xbf16>, vector<128x32xbf16>, vector<16x32xf32> -> vector<16x32xf32>
    %261 = arith.addf %214, %260 : vector<16x32xf32>
    %c0_109 = arith.constant 0 : index
    %c0_110 = arith.constant 0 : index
    %c0_111 = arith.constant 0 : index
    %262 = vector.load %arg14[%c0_109, %c0_110, %c0_111] : memref<1x1x32xf32, #tpu.memory_space<vmem>>, vector<1x1x32xf32>
    %263 = vector.shape_cast %262 : vector<1x1x32xf32> to vector<1x32xf32>
    %264 = vector.broadcast %263 : vector<1x32xf32> to vector<16x32xf32>
    %265 = arith.addf %261, %264 : vector<16x32xf32>
    %c0_112 = arith.constant 0 : index
    %c0_113 = arith.constant 0 : index
    %266 = vector.load %arg16[%c0_112, %c0_113] : memref<16x32xf32, #tpu.memory_space<vmem>>, vector<16x32xf32>
    tpu.vector_store %arg16[%c0_112, %c0_113], %265 {strides = array<i32>} : memref<16x32xf32, #tpu.memory_space<vmem>>, vector<16x32xf32>,
    %c1_i32 = arith.constant 1 : i32
    %267 = arith.cmpi eq, %arg1, %c1_i32 : i32
    %268 = arith.extui %267 : i1 to i32
    %c0_i32_114 = arith.constant 0 : i32
    %269 = arith.cmpi ne, %268, %c0_i32_114 : i32
    scf.if %269 {
      %270 = vector.extract_strided_slice %265 {offsets = [0, 0], sizes = [8, 32], strides = [1, 1]} : vector<16x32xf32> to vector<8x32xf32>
      %c0_115 = arith.constant 0 : index
      %c0_116 = arith.constant 0 : index
      %c0_117 = arith.constant 0 : index
      %271 = vector.load %arg15[%c0_115, %c0_116, %c0_117] : memref<2x8x32xf32, #tpu.memory_space<vmem>>, vector<1x8x32xf32>
      %272 = vector.shape_cast %271 : vector<1x8x32xf32> to vector<8x32xf32>
      %273 = vector.shape_cast %270 : vector<8x32xf32> to vector<1x8x32xf32>
      tpu.vector_store %arg15[%c0_115, %c0_116, %c0_117], %273 {strides = array<i32>} : memref<2x8x32xf32, #tpu.memory_space<vmem>>, vector<1x8x32xf32>,
      %274 = vector.extract_strided_slice %265 {offsets = [8, 0], sizes = [8, 32], strides = [1, 1]} : vector<16x32xf32> to vector<8x32xf32>
      %c1 = arith.constant 1 : index
      %c0_118 = arith.constant 0 : index
      %c0_119 = arith.constant 0 : index
      %275 = vector.load %arg15[%c1, %c0_118, %c0_119] : memref<2x8x32xf32, #tpu.memory_space<vmem>>, vector<1x8x32xf32>
      %276 = vector.shape_cast %275 : vector<1x8x32xf32> to vector<8x32xf32>
      %277 = vector.shape_cast %274 : vector<8x32xf32> to vector<1x8x32xf32>
      tpu.vector_store %arg15[%c1, %c0_118, %c0_119], %277 {strides = array<i32>} : memref<2x8x32xf32, #tpu.memory_space<vmem>>, vector<1x8x32xf32>,
    } else {
    }
    return
  }
  func.func @transform_0(%arg0: i32, %arg1: i32) -> (i32, i32, i32) {
    %c0_i32 = arith.constant 0 : i32
    %c0_i32_0 = arith.constant 0 : i32
    %c0_i32_1 = arith.constant 0 : i32
    return %arg0, %c0_i32, %c0_i32_0 : i32, i32, i32
  }
  func.func @transform_1(%arg0: i32, %arg1: i32) -> (i32, i32, i32) {
    %c0_i32 = arith.constant 0 : i32
    %c0_i32_0 = arith.constant 0 : i32
    %c0_i32_1 = arith.constant 0 : i32
    return %arg1, %c0_i32, %c0_i32_0 : i32, i32, i32
  }
  func.func @transform_2(%arg0: i32, %arg1: i32) -> (i32, i32, i32) {
    %c0_i32 = arith.constant 0 : i32
    %c0_i32_0 = arith.constant 0 : i32
    %c0_i32_1 = arith.constant 0 : i32
    return %arg1, %c0_i32, %c0_i32_0 : i32, i32, i32
  }
  func.func @transform_3(%arg0: i32, %arg1: i32) -> (i32, i32, i32) {
    %c0_i32 = arith.constant 0 : i32
    %c0_i32_0 = arith.constant 0 : i32
    %c0_i32_1 = arith.constant 0 : i32
    return %arg1, %c0_i32, %c0_i32_0 : i32, i32, i32
  }
  func.func @transform_4(%arg0: i32, %arg1: i32) -> (i32, i32, i32) {
    %c0_i32 = arith.constant 0 : i32
    %c0_i32_0 = arith.constant 0 : i32
    %c0_i32_1 = arith.constant 0 : i32
    return %arg1, %c0_i32, %c0_i32_0 : i32, i32, i32
  }
  func.func @transform_5(%arg0: i32, %arg1: i32) -> (i32, i32, i32) {
    %c0_i32 = arith.constant 0 : i32
    %c0_i32_0 = arith.constant 0 : i32
    %c0_i32_1 = arith.constant 0 : i32
    return %arg1, %c0_i32, %c0_i32_0 : i32, i32, i32
  }
  func.func @transform_6(%arg0: i32, %arg1: i32) -> (i32, i32, i32) {
    %c0_i32 = arith.constant 0 : i32
    %c0_i32_0 = arith.constant 0 : i32
    %c0_i32_1 = arith.constant 0 : i32
    return %arg1, %c0_i32, %c0_i32_0 : i32, i32, i32
  }
  func.func @transform_7(%arg0: i32, %arg1: i32) -> (i32, i32, i32) {
    %c0_i32 = arith.constant 0 : i32
    %c0_i32_0 = arith.constant 0 : i32
    %c0_i32_1 = arith.constant 0 : i32
    return %arg1, %c0_i32, %c0_i32_0 : i32, i32, i32
  }
  func.func @transform_8(%arg0: i32, %arg1: i32) -> (i32, i32, i32) {
    %c0_i32 = arith.constant 0 : i32
    %c0_i32_0 = arith.constant 0 : i32
    %c0_i32_1 = arith.constant 0 : i32
    return %arg1, %c0_i32, %c0_i32_0 : i32, i32, i32
  }
  func.func @transform_9(%arg0: i32, %arg1: i32) -> (i32, i32, i32) {
    %c0_i32 = arith.constant 0 : i32
    %c0_i32_0 = arith.constant 0 : i32
    %c0_i32_1 = arith.constant 0 : i32
    return %arg1, %c0_i32, %c0_i32_0 : i32, i32, i32
  }
  func.func @transform_10(%arg0: i32, %arg1: i32) -> (i32, i32, i32) {
    %c0_i32 = arith.constant 0 : i32
    %c0_i32_0 = arith.constant 0 : i32
    %c0_i32_1 = arith.constant 0 : i32
    return %arg1, %c0_i32, %c0_i32_0 : i32, i32, i32
  }
  func.func @transform_11(%arg0: i32, %arg1: i32) -> (i32, i32, i32) {
    %c0_i32 = arith.constant 0 : i32
    %c0_i32_0 = arith.constant 0 : i32
    %c0_i32_1 = arith.constant 0 : i32
    return %arg1, %c0_i32, %c0_i32_0 : i32, i32, i32
  }
  func.func @transform_12(%arg0: i32, %arg1: i32) -> (i32, i32, i32) {
    %c0_i32 = arith.constant 0 : i32
    %c0_i32_0 = arith.constant 0 : i32
    %c0_i32_1 = arith.constant 0 : i32
    return %arg1, %c0_i32, %c0_i32_0 : i32, i32, i32
  }
  func.func @transform_13(%arg0: i32, %arg1: i32) -> (i32, i32, i32) {
    %c0_i32 = arith.constant 0 : i32
    %c0_i32_0 = arith.constant 0 : i32
    %c0_i32_1 = arith.constant 0 : i32
    return %arg0, %c0_i32, %c0_i32_0 : i32, i32, i32
  }
}

</mosaic_0001>

<bundles_post_ra>
// kernel: tpu_custom_call.1
= control target key start
LH: loop header
LB: loop body
LE: loop exit
PB: predicated region body
PF: predicated region fallthrough
CT: control target
= control target key end

     0   :  { %s3669_s0 = inlined_call_operand.vmem [shape: f32[4,8,32], index: 0, kind: input, shape index: {}]   ;;  %s3670_s1 = inlined_call_operand.vmem [shape: f32[2,1,32], index: 1, kind: input, shape index: {}]   ;;  %s3671_s2 = inlined_call_operand.vmem [shape: f32[2,1,32], index: 2, kind: input, shape index: {}]   ;;  %s3672_s3 = inlined_call_operand.vmem [shape: bf16[2,32,96], index: 3, kind: input, shape index: {}]   ;;  %s3673_s4 = inlined_call_operand.vmem [shape: f32[2,1,96], index: 4, kind: input, shape index: {}]   ;;  %s3674_s5 = inlined_call_operand.vmem [shape: bf16[2,32,32], index: 5, kind: input, shape index: {}]   ;;  %s3675_s6 = inlined_call_operand.vmem [shape: f32[2,1,32], index: 6, kind: input, shape index: {}]   ;;  %s3676_s7 = inlined_call_operand.vmem [shape: f32[2,1,32], index: 7, kind: input, shape index: {}]   ;;  %s3677_s8 = inlined_call_operand.vmem [shape: f32[2,1,32], index: 8, kind: input, shape index: {}]   ;;  %s3678_s9 = inlined_call_operand.vmem [shape: bf16[2,32,128], index: 9, kind: input, shape index: {}]   ;;  %s3679_s10 = inlined_call_operand.vmem [shape: f32[2,1,128], index: 10, kind: input, shape index: {}]   ;;  %s3680_s11 = inlined_call_operand.vmem [shape: bf16[2,128,32], index: 11, kind: input, shape index: {}]   ;;  %s3681_s12 = inlined_call_operand.vmem [shape: f32[2,1,32], index: 12, kind: input, shape index: {}]   ;;  %s3682_s13 = inlined_call_operand.hbm [shape: f32[4,8,32], index: 13, kind: output, shape index: {}]  }
   0x1   :  { %3698 = sst [smem:[#allocation19_spill]] %s3669_s0 }
   0x2   :  { %3699 = sst [smem:[#allocation20_spill]] %s3672_s3 }
   0x3   :  { %3700 = sst [smem:[#allocation21_spill]] %s3674_s5 }
   0x4   :  { %3701 = sst [smem:[#allocation22_spill]] %s3676_s7 }
   0x5   :  { %3702 = sst [smem:[#allocation23_spill]] %s3680_s11 }
   0x6   :  { %3703 = sst [smem:[#allocation24_spill]] %s3682_s13 }
   0x7   :  { %18 = vsyncpa [#allocation4], 0 }
   0x8   :  { %20 = vsyncpa [#allocation4 + $0x1], 0  ;;  %s3145_s25 = smov 0   ;;  %s3147_s26 = smov 0  }
   0x9   :  { %s3149_s27 = smov 0   ;;  %s3151_s28 = smov 0  }
   0xa   :  { %s3153_s29 = smov 0   ;;  %s3155_s30 = smov 0  }
   0xb   :  { %s3157_s14 = smov 0   ;;  %s3159_s15 = smov 0  }
   0xc LB: > { %3704 = sst [smem:[#allocation6_spill]] %s3029_s25  ;;  %s2498_s16 = sadd.s32 4294967295, %s3057_s15   ;;  %s3057_s15 = sphi %s3159_s15, %s26_s15   ;;  %s3053_s14 = sphi %s3157_s14, %s3747_s14   ;;  %s3049_s30 = sphi %s3155_s30, %s3746_s30   ;;  %s3045_s29 = sphi %s3153_s29, %s3745_s29   ;;  %s3041_s28 = sphi %s3151_s28, %s3744_s28   ;;  %s3037_s27 = sphi %s3149_s27, %s3743_s27   ;;  %s3033_s26 = sphi %s3147_s26, %s3742_s26   ;;  %s3029_s25 = sphi %s3145_s25, %s3741_s25  }
   0xd   : > { %3705 = sst [smem:[#allocation7_spill]] %s3033_s26  ;;  %s2499_s17 = sadd.s32 4294967294, %s3057_s15  }
   0xe   : > { %3706 = sst [smem:[#allocation8_spill]] %s3037_s27  ;;  %s35_s18 = sadd.s32 1, %s3049_s30 }
   0xf   : > { %3707 = sst [smem:[#allocation9_spill]] %s3041_s28  ;;  %p36_p0 = scmp.ge.s32.totalorder %s35_s18, 2 }
  0x10   : > { %3708 = sst [smem:[#allocation10_spill]] %s3045_s29  ;;  %s38_s19 = sadd.s32 1, %s3053_s14 }
  0x11   : > { %3709 = sst [smem:[#allocation11_spill]] %s3049_s30  ;;  %p393_p1 = scmp.ne.s32.totalorder %s3037_s27, %s3033_s26 }
  0x12   : > { %3710 = sst [smem:[#allocation12_spill]] %s3053_s14  ;;  %p394_p2 = scmp.eq.s32.totalorder %s2498_s16, 3 }
  0x13   : > { %3711 = sst [smem:[#allocation13_spill]] %s3057_s15  ;;  %s3749_s18 = smov (%p36_p0, %s35_s18), 0 }
  0x14   : > { %3712 = sst [smem:[#allocation14_spill]] %s3749_s18  ;;  %s3751_s19 = smov (!%p36_p0, %s38_s19), %s3053_s14 }
  0x15   : > { %p3194_p3 = por %p394_p2, %p393_p1  ;;  %p399_p4 = scmp.ne.s32.totalorder %s3033_s26, %s3029_s25 }
  0x16   : > { %p40_p5 = scmp.ge.s32.totalorder %s3751_s19, 2  ;;  %p400_p6 = scmp.eq.s32.totalorder %s2499_s17, 3 }
  0x17   : > { %s3713_s20 = scalar_select %p3194_p3, 1, 0 }
  0x18   : > { %p2502_p7 = scmp.ge.s32.totalorder %s3057_s15, 1  ;;  %p507_p8 = scmp.lt.s32.totalorder %s3057_s15, 5 }
  0x19   : > { %3714 = sst [smem:[#allocation15_spill]] %s3713_s20  ;;  %s3753_s19 = smov (%p40_p5, %s3751_s19), 0 }
  0x1a   : > { %3715 = sst [smem:[#allocation16_spill]] %s3753_s19  ;;  %p3204_p9 = por %p400_p6, %p399_p4 }
  0x1b   : > { %p508_p10 = pnand %p2502_p7, %p507_p8  ;;  %s380_s22 = ssub.s32 %s3053_s14, %s3753_s19 }
  0x1c   : > { %s3716_s21 = scalar_select %p3204_p9, 1, 0 }
  0x1d   : > { %s383_s23 = sadd.s32 1, %s3037_s27  ;;  %p381_p11 = scmp.eq.s32.totalorder %s380_s22, 0 }
  0x1e   : > { %3717 = sst [smem:[#allocation17_spill]] %s3716_s21  ;;  %511 = sbr.rel (%p508_p10) target bundleno = 5868 (0x16ec), region = 72 }
  0x1f   : > { %s3212_s24 = scalar_select %p381_p11, %s3037_s27, %s383_s23  }
  0x20   : > { %s3685_s16 = sand.u32 (!%p508_p10), 1, %s3033_s26   ;;  %s2504_s17 = sshll.u32 (!%p508_p10), %s3045_s29, 1 }
  0x21   : > { %3718 = sst [smem:[#allocation18_spill]] %s3212_s24  ;;  %s2503_s18 = sshll.u32 (!%p508_p10), %s3685_s16, 4 }
  0x22   : > { %p596_p12 = scmp.lt.s32.totalorder (!%p508_p10), %s2504_s17, 3  ;;  %p601_p13 = scmp.lt.s32.totalorder (!%p508_p10), %s3041_s28, 1 }
  0x23   : > { %s3719_s0 = sld [smem:[#allocation19_spill]]  ;;  %s3279_s26 = scalar_lea.vmem [#allocation3], %s2503_s18 }
  0x24   : > { %s3755_s17 = smov (!%p596_p12, %s2504_s17), 3  ;;  %s3720_s3 = sld [smem:[#allocation20_spill]] }
  0x25   : > { %s3220_s30 = scalar_select %p601_p13, %s3041_s28, 1 }
  0x26   : > { %s2505_s22 = sshll.u32 %s3755_s17, 3  ;;  %s3721_s5 = sld [smem:[#allocation21_spill]] }
  0x27   : > { %s2571_s13 = sshll.u32 %s3220_s30, 4  ;;  %s636_s11 = scalar_lea.vmem %s3679_s10, %s3220_s30 }
  0x28   : > { %s3263_s17 = scalar_lea.vmem %s3678_s9, %s2571_s13  ;;  %s644_s25 = scalar_lea.vmem %s3681_s12, %s3220_s30 }
  0x29   : > { %s599_s16 = scalar_lea.vmem %s3719_s0, %s2505_s22  ;;  %s628_s0 = scalar_lea.vmem %s3677_s8, %s3220_s30 }
  0x2a   : > { %s3237_s29 = scalar_lea.vmem %s3720_s3, %s2571_s13  ;;  %s3723_s27 = sld [smem:[#allocation23_spill]] }
  0x2b   : > { %s3724_s20 = sld [smem:[#allocation9_spill]] }
  0x2c   : > { %s3246_s23 = scalar_lea.vmem %s3721_s5, %s2571_s13  ;;  %s2574_s5 = sshll.u32 %s3220_s30, 6 }
  0x30   : > { %s3277_s7 = scalar_lea.vmem %s3723_s27, %s2574_s5 }
  0x31   : > { %p2514_p0 = scmp.ne.s32.totalorder %s3724_s20, 0 }
  0x33   : > { %650 = sbr.rel (%p2514_p0) target bundleno = 58 (0x3a), region = 76 }
  0x38   : > { %v651_v0 = vld [vmem:[%s599_s16] sm:$0xff]  ;;  %vm652_vm0 = vcmask 261120   ;;  %v2515_v1 = vld [vmem:[%s599_s16 + $0x8] sm:$0xff] }
  0x39   : > { %653 = vst.msk [vmem:[#allocation2] sm:$0xff] %vm652_vm0, %v651_v0  ;;  %656 = vst.msk [vmem:[#allocation2 + $0x8] sm:$0xff] %vm652_vm0, %v2515_v1 }
  0x3a PF: > { %vm661_vm1 = vcmask 261120   ;;  %v2905_v16 = vld [vmem:[%s3237_s29 + $0x8] sm:$0xff]   ;;  %v3059_v17 = vmov 0.0   ;;  %vm3060_vm2 = vmmov 0   ;;  %v2906_v18 = vld [vmem:[%s3237_s29] sm:$0xff]   ;;  %s3725_s13 = scalar_lea.vmem %s3670_s1, %s3220_s30  ;;  %s3726_s18 = scalar_lea.vmem %s3671_s2, %s3220_s30  ;;  %vm777_vm3 = vcmask 64512  }
  0x3b   : > { %2639 = vmatprep.subr.bf16.mxu1 %v3059_v17  ;;  %2643 = vmatprep.mubr.msk.bf16.mxu1 %vm3060_vm2, %v3059_v17  ;;  %v2516_v27 = vld [vmem:[%s3725_s13] ss:$0 sm:$0xff]  ;;  %s3727_s19 = scalar_lea.vmem %s3673_s4, %s3220_s30  ;;  %s3061_s22 = smov 96   ;;  %vm841_vm4 = vcmask 1043456  }
  0x3c   : > { %2640 = vmatpush3.bf16.msra.mxu1 %v2905_v16  ;;  %2665 = vmatprep.subr.bf16.mxu0 %v3059_v17  ;;  %v2517_v31 = vld [vmem:[%s3726_s18] ss:$0 sm:$0xff]  ;;  %s3062_s14 = smov 88   ;;  %s3063_s24 = smov 64  }
  0x3d   : > { %2641 = vmatprep.subr.bf16.mxu1 %v3059_v17  ;;  %2667 = vmatprep.mubr.msk.bf16.mxu0 %vm3060_vm2, %v3059_v17  ;;  %v2518_v37 = vld [vmem:[%s3727_s19] ss:$0 sm:$0xff]  ;;  %s3064_s15 = smov 120   ;;  %s3065_s21 = smov 56  }
  0x3e   : > { %s3066_s20 = smov 112   ;;  %s3067_s3 = smov 80  }
  0x3f   : > { %s3068_s5 = smov 72   ;;  %s3069_s13 = smov 104  }
  0x40   : > { %v3282_v2 = vld [vmem:[#allocation2] sm:$0xff]  ;;  %v3284_v3 = vld [vmem:[#allocation2 + $0x8] sm:$0xff]  ;;  %2642 = vmatpush3.bf16.msra.mxu1 %v2906_v18  ;;  %s3070_s27 = smov 48   ;;  %s3071_s29 = smov 40  }
  0x41   : > { %v662_v4 = vsel %vm661_vm1, %v3282_v2, 0.0  ;;  %v665_v5 = vsel %vm661_vm1, %v3284_v3, 0.0  ;;  %2647 = vmatprep.subr.bf16.mxu1 %v3059_v17  ;;  %s3728_s16 = scalar_lea.vmem %s3675_s6, %s3220_s30 }
  0x42   : > { %663 = vadd.xlane.f32.xlu0 %v662_v4 }
  0x46   : > { %666 = vadd.xlane.f32.xlu0 %v665_v5 }
  0xcb   : > { %v664_v6 = vpop.xlane.xlu0 %663 }
  0xcc   : > { %v669_v7 = vmul.f32 0.03125, %v664_v6 }
  0xce   : > { %v671_v8 = vsub.f32 %v3282_v2, %v669_v7 }
  0xcf   : > { %v667_v9 = vpop.xlane.xlu0 %666 }
  0xd0   : > { %v670_v10 = vmul.f32 0.03125, %v667_v9  ;;  %v673_v11 = vmul.f32 %v671_v8, %v671_v8 }
  0xd2   : > { %v672_v12 = vsub.f32 %v3284_v3, %v670_v10  ;;  %v675_v13 = vsel %vm661_vm1, %v673_v11, 0.0 }
  0xd3   : > { %676 = vadd.xlane.f32.xlu1 %v675_v13 }
  0xd4   : > { %v674_v14 = vmul.f32 %v672_v12, %v672_v12 }
  0xd6   : > { %v678_v15 = vsel %vm661_vm1, %v674_v14, 0.0 }
  0xd7   : > { %679 = vadd.xlane.f32.xlu1 %v678_v15 }
 0x15c   : > { %v677_v19 = vpop.xlane.xlu1 %676 }
 0x15d   : > { %v681_v20 = vmul.f32 0.03125, %v677_v19 }
 0x15f   : > { %v683_v21 = vadd.f32 1e-05, %v681_v20  ;;  %v998_v20 = vld [vmem:[%s3246_s23 + $0x4] sm:$0xf] }
 0x160   : > { %v680_v22 = vpop.xlane.xlu1 %679 }
 0x161   : > { %2917 = vrsqrt.f32 %v683_v21  ;;  %v682_v23 = vmul.f32 0.03125, %v680_v22  ;;  %v3362_v21 = vsel %vm841_vm4, %v998_v20, 0 }
 0x163   : > { %v684_v24 = vadd.f32 1e-05, %v682_v23 }
 0x165   : > { %2919 = vrsqrt.f32 %v684_v24  ;;  %v886_v24 = vld [vmem:[%s3246_s23] sm:$0xf] }
 0x16e   : > { %v2918_v25 = vpop.eup %2917 }
 0x16f   : > { %v687_v26 = vmul.f32 %v2918_v25, %v671_v8 }
 0x171   : > { %v695_v30 = vmul.f32 %v2516_v27, %v687_v26 }
 0x172   : > { %v2920_v28 = vpop.eup %2919 }
 0x173   : > { %v688_v29 = vmul.f32 %v2920_v28, %v672_v12  ;;  %v703_v33 = vadd.f32 %v2517_v31, %v695_v30 }
 0x175   : > { %v696_v32 = vmul.f32 %v2516_v27, %v688_v29  ;;  %v3368_v27 = vsel %vm841_vm4, %v886_v24, 0 }
 0x177   : > { %v704_v34 = vadd.f32 %v2517_v31, %v696_v32 }
 0x179   : > { %v705_v35 = vpack.c.bf16 %v704_v34, %v703_v33 }
 0x17b   : > { %2644 = vmatmul.mubr.msk.bf16.vlgmr.msra.gmra.mxu1 %vm661_vm1, %v705_v35 }
 0x17c   : > { %2649 = vmatprep.mubr.msk.bf16.mxu1 %vm3060_vm2, %v3059_v17 }
 0x23b   : > { %v766_v36 = vpop.f32.mrf.mxu1 }
 0x23c   : > { %v767_v40 = vadd.f32 %v2518_v37, %v766_v36 }
 0x23d   : > { %v2645_v38 = vpop.f32.mrf.mxu1 }
 0x23f   : > { %v769_v39 = vpop.f32.mrf.mxu1 }
 0x240   : > { %v770_v41 = vadd.f32 %v2518_v37, %v769_v39 }
 0x241   : > { %v2646_v42 = vpop.f32.mrf.mxu1 }
 0x242   : > { %v3322_v43 = vpack.c.bf16 %v770_v41, %v767_v40 }
 0x244   : > { %775 = vrot.lane.b32.xlu0 %v3322_v43, %s3061_s22 }
 0x248   : > { %889 = vrot.lane.b32.xlu0 %v3322_v43, %s3062_s14 }
 0x2b6   : > { %v776_v44 = vpop.permute.xlu0 %775 }
 0x2b7   : > { %v782_v45 = vsel %vm777_vm3, %v776_v44, 0 }
 0x2b8   : > { %2648 = vmatpush3.bf16.xpose.msra.mxu1 %v782_v45 }
 0x2b9   : > { %2653 = vmatprep.subr.bf16.mxu1 %v3059_v17 }
 0x2ba   : > { %v890_v61 = vpop.permute.xlu0 %889 }
 0x2bb   : > { %v895_v63 = vsel %vm777_vm3, %v890_v61, 0 }
 0x2bf   : > { %2650 = vmatmul.mubr.msk.bf16.vlgmr.msra.gmra.mxu1 %vm777_vm3, %v3322_v43 }
 0x2c0   : > { %2655 = vmatprep.mubr.msk.bf16.mxu1 %vm3060_vm2, %v3059_v17 }
 0x37f   : > { %v818_v46 = vpop.f32.mrf.mxu1 }
 0x380   : > { %v824_v47 = vsel %vm777_vm3, %v818_v46, -inf }
 0x381   : > { %825 = vmax.xlane.f32.xlu1 %v824_v47  ;;  %v2651_v48 = vpop.f32.mrf.mxu1 }
 0x383   : > { %v821_v49 = vpop.f32.mrf.mxu1 }
 0x385   : > { %v2652_v50 = vpop.f32.mrf.mxu1 }
 0x40a   : > { %v826_v51 = vpop.xlane.xlu1 %825 }
 0x40b   : > { %v827_v52 = vsub.f32 %v818_v46, %v826_v51 }
 0x40d   : > { %v828_v53 = vmul.f32 1.442695, %v827_v52 }
 0x40f   : > { %2921 = vpow2.f32 %v828_v53 }
 0x41c   : > { %v2922_v54 = vpop.eup %2921 }
 0x41d   : > { %v830_v55 = vsel %vm777_vm3, %v2922_v54, 0.0 }
 0x41e   : > { %831 = vadd.xlane.f32.xlu1 %v830_v55 }
 0x42f   : > { %836 = vrot.lane.b32.xlu1 %v3322_v43, %s3063_s24 }
 0x433   : > { %887 = vrot.lane.b32.xlu1 %v3322_v43, %s3064_s15 }
 0x4a7   : > { %v832_v56 = vpop.xlane.xlu1 %831 }
 0x4a8   : > { %2923 = vrcp.f32 %v832_v56 }
 0x4ab   : > { %v837_v57 = vpop.permute.xlu1 %836 }
 0x4ac   : > { %v843_v58 = vsel %vm841_vm4, %v837_v57, 0 }
 0x4ad   : > { %2654 = vmatpush3.bf16.msra.mxu1 %v843_v58 }
 0x4ae   : > { %2659 = vmatprep.subr.bf16.mxu1 %v3059_v17 }
 0x4af   : > { %v888_v0 = vpop.permute.xlu1 %887 }
 0x4b5   : > { %v2924_v59 = vpop.eup %2923 }
 0x4b6   : > { %v834_v60 = vmul.f32 %v2924_v59, %v2922_v54 }
 0x4b8   : > { %v835_v62 = vpack.c.bf16 %v834_v60, %v834_v60 }
 0x4ba   : > { %2656 = vmatmul.mubr.msk.bf16.vlgmr.msra.gmra.mxu1 %vm777_vm3, %v835_v62 }
 0x4bb   : > { %2660 = vmatpush3.bf16.xpose.msra.mxu1 %v895_v63  ;;  %2661 = vmatprep.mubr.msk.bf16.mxu1 %vm3060_vm2, %v3059_v17 }
 0x4bc   : > { %2671 = vmatprep.subr.bf16.mxu1 %v3059_v17 }
 0x4c2   : > { %2662 = vmatmul.mubr.msk.bf16.vlgmr.msra.gmra.mxu1 %vm777_vm3, %v888_v0 }
 0x4c3   : > { %2673 = vmatprep.mubr.msk.bf16.mxu1 %vm3060_vm2, %v3059_v17  ;;  %2672 = vmatpush3.bf16.msra.mxu1 %v3362_v21 }
 0x4c4   : > { %2683 = vmatprep.subr.bf16.mxu1 %v3059_v17 }
 0x57a   : > { %v879_v1 = vpop.f32.mrf.mxu1 }
 0x57b   : > { %v885_v28 = vpack.c.bf16 %v879_v1, %v879_v1  ;;  %v1202_v1 = vld [vmem:[%s3246_s23 + $0x8] sm:$0xf] }
 0x57c   : > { %v2657_v4 = vpop.f32.mrf.mxu1 }
 0x57d   : > { %v3410_v4 = vsel %vm841_vm4, %v1202_v1, 0 }
 0x57e   : > { %v882_v5 = vpop.f32.mrf.mxu1 }
 0x580   : > { %v2658_v6 = vpop.f32.mrf.mxu1 }
 0x582   : > { %v931_v7 = vpop.f32.mrf.mxu1 }
 0x583   : > { %v937_v8 = vsel %vm777_vm3, %v931_v7, -inf }
 0x584   : > { %938 = vmax.xlane.f32.xlu0 %v937_v8  ;;  %v2663_v9 = vpop.f32.mrf.mxu1 }
 0x586   : > { %v934_v10 = vpop.f32.mrf.mxu1 }
 0x588   : > { %v2664_v11 = vpop.f32.mrf.mxu1 }
 0x59a   : > { %949 = vrot.lane.b32.xlu0 %v3322_v43, %s3065_s21 }
 0x59e   : > { %1091 = vrot.lane.b32.xlu0 %v3322_v43, %s3066_s20 }
 0x60d   : > { %v939_v12 = vpop.xlane.xlu0 %938 }
 0x60e   : > { %v940_v13 = vsub.f32 %v931_v7, %v939_v12 }
 0x610   : > { %v941_v14 = vmul.f32 1.442695, %v940_v13 }
 0x611   : > { %v950_v15 = vpop.permute.xlu0 %949 }
 0x612   : > { %2925 = vpow2.f32 %v941_v14  ;;  %v955_v16 = vsel %vm841_vm4, %v950_v15, 0  ;;  %v3421_v15 = vrot.slane %v3322_v43, 4 }
 0x613   : > { %2666 = vmatpush3.bf16.msra.mxu0 %v955_v16 }
 0x614   : > { %2677 = vmatprep.subr.bf16.mxu0 %v3059_v17 }
 0x615   : > { %v1092_v37 = vpop.permute.xlu0 %1091 }
 0x61f   : > { %v2926_v18 = vpop.eup %2925 }
 0x620   : > { %v943_v19 = vsel %vm777_vm3, %v2926_v18, 0.0 }
 0x621   : > { %944 = vadd.xlane.f32.xlu1 %v943_v19 }
 0x632   : > { %1093 = vrot.lane.b32.xlu1 %v3322_v43, %s3067_s3 }
 0x6aa   : > { %v945_v22 = vpop.xlane.xlu1 %944 }
 0x6ab   : > { %2927 = vrcp.f32 %v945_v22 }
 0x6ae   : > { %v1094_v29 = vpop.permute.xlu1 %1093 }
 0x6af   : > { %v1099_v33 = vsel %vm777_vm3, %v1094_v29, 0 }
 0x6b8   : > { %v2928_v23 = vpop.eup %2927 }
 0x6b9   : > { %v947_v25 = vmul.f32 %v2928_v23, %v2926_v18 }
 0x6bb   : > { %v948_v26 = vpack.c.bf16 %v947_v25, %v947_v25 }
 0x6bd   : > { %2668 = vmatmul.mubr.msk.bf16.vlgmr.msra.gmra.mxu0 %vm777_vm3, %v948_v26 }
 0x6be   : > { %2678 = vmatpush3.bf16.msra.mxu0 %v3368_v27  ;;  %2679 = vmatprep.mubr.msk.bf16.mxu0 %vm3060_vm2, %v3059_v17 }
 0x6bf   : > { %2689 = vmatprep.subr.bf16.mxu0 %v3059_v17 }
 0x6c5   : > { %2680 = vmatmul.mubr.msk.bf16.vlgmr.msra.gmra.mxu0 %vm777_vm3, %v885_v28 }
 0x6c6   : > { %2691 = vmatprep.mubr.msk.bf16.mxu0 %vm3060_vm2, %v3059_v17 }
 0x77d   : > { %v991_v30 = vpop.f32.mrf.mxu0 }
 0x77e   : > { %v997_v31 = vpack.c.bf16 %v991_v30, %v991_v30 }
 0x77f   : > { %v2669_v32 = vpop.f32.mrf.mxu0 }
 0x780   : > { %2674 = vmatmul.mubr.msk.bf16.vlgmr.msra.gmra.mxu1 %vm777_vm3, %v997_v31 }
 0x781   : > { %2684 = vmatpush3.bf16.xpose.msra.mxu1 %v1099_v33  ;;  %v994_v34 = vpop.f32.mrf.mxu0  ;;  %2685 = vmatprep.mubr.msk.bf16.mxu1 %vm3060_vm2, %v3059_v17 }
 0x782   : > { %2695 = vmatprep.subr.bf16.mxu1 %v3059_v17 }
 0x783   : > { %v2670_v35 = vpop.f32.mrf.mxu0 }
 0x785   : > { %v3383_v36 = vpop.f32.mrf.mxu0 }
 0x787   : > { %v2681_v38 = vpop.f32.mrf.mxu0 }
 0x788   : > { %2686 = vmatmul.mubr.msk.bf16.vlgmr.msra.gmra.mxu1 %vm777_vm3, %v1092_v37 }
 0x789   : > { %v1088_v39 = vpop.f32.mrf.mxu0  ;;  %2697 = vmatprep.mubr.msk.bf16.mxu1 %vm3060_vm2, %v3059_v17  ;;  %2696 = vmatpush3.bf16.msra.mxu1 %v3410_v4 }
 0x78a   : > { %2707 = vmatprep.subr.bf16.mxu1 %v3059_v17 }
 0x78b   : > { %v2682_v40 = vpop.f32.mrf.mxu0 }
 0x78c   : > { %v1361_v40 = vld [vmem:[%s3246_s23 + $0xc] sm:$0xf] }
 0x840   : > { %v3388_v41 = vpop.f32.mrf.mxu1 }
 0x842   : > { %v2675_v42 = vpop.f32.mrf.mxu1 }
 0x844   : > { %v1042_v44 = vpop.f32.mrf.mxu1 }
 0x846   : > { %v2676_v45 = vpop.f32.mrf.mxu1 }
 0x848   : > { %v1135_v46 = vpop.f32.mrf.mxu1 }
 0x849   : > { %v1141_v47 = vsel %vm777_vm3, %v1135_v46, -inf }
 0x84a   : > { %1142 = vmax.xlane.f32.xlu1 %v1141_v47  ;;  %v2687_v48 = vpop.f32.mrf.mxu1 }
 0x84c   : > { %v1138_v49 = vpop.f32.mrf.mxu1 }
 0x84e   : > { %v2688_v50 = vpop.f32.mrf.mxu1 }
 0x85b   : > { %1252 = vrot.lane.b32.xlu1 %v3322_v43, %s3068_s5 }
 0x85f   : > { %1250 = vrot.lane.b32.xlu1 %v3322_v43, %s3069_s13 }
 0x8d3   : > { %v1143_v51 = vpop.xlane.xlu1 %1142 }
 0x8d4   : > { %v1144_v52 = vsub.f32 %v1135_v46, %v1143_v51 }
 0x8d6   : > { %v1145_v53 = vmul.f32 1.442695, %v1144_v52 }
 0x8d7   : > { %v1253_v61 = vpop.permute.xlu1 %1252 }
 0x8d8   : > { %2929 = vpow2.f32 %v1145_v53  ;;  %v1258_v63 = vsel %vm777_vm3, %v1253_v61, 0 }
 0x8db   : > { %v1251_v0 = vpop.permute.xlu1 %1250 }
 0x8e5   : > { %v2930_v54 = vpop.eup %2929 }
 0x8e6   : > { %v1147_v55 = vsel %vm777_vm3, %v2930_v54, 0.0 }
 0x8e7   : > { %1148 = vadd.xlane.f32.xlu0 %v1147_v55 }
 0x8fd   : > { %1153 = vrot.lane.b32.xlu0 %v3322_v43, %s3070_s27 }
 0x970   : > { %v1149_v56 = vpop.xlane.xlu0 %1148 }
 0x971   : > { %2931 = vrcp.f32 %v1149_v56 }
 0x974   : > { %v1154_v57 = vpop.permute.xlu0 %1153 }
 0x975   : > { %v1159_v58 = vsel %vm841_vm4, %v1154_v57, 0 }
 0x976   : > { %2690 = vmatpush3.bf16.msra.mxu0 %v1159_v58 }
 0x977   : > { %2701 = vmatprep.subr.bf16.mxu0 %v3059_v17 }
 0x97e   : > { %v2932_v59 = vpop.eup %2931 }
 0x97f   : > { %v1151_v60 = vmul.f32 %v2932_v59, %v2930_v54 }
 0x981   : > { %v1152_v62 = vpack.c.bf16 %v1151_v60, %v1151_v60 }
 0x983   : > { %2692 = vmatmul.mubr.msk.bf16.vlgmr.msra.gmra.mxu0 %vm777_vm3, %v1152_v62 }
 0x984   : > { %2702 = vmatpush3.bf16.xpose.msra.mxu0 %v1258_v63  ;;  %2703 = vmatprep.mubr.msk.bf16.mxu0 %vm3060_vm2, %v3059_v17 }
 0x985   : > { %2713 = vmatprep.subr.bf16.mxu0 %v3059_v17 }
 0x98b   : > { %2704 = vmatmul.mubr.msk.bf16.vlgmr.msra.gmra.mxu0 %vm777_vm3, %v1251_v0 }
 0x98c   : > { %2715 = vmatprep.mubr.msk.bf16.mxu0 %vm3060_vm2, %v3059_v17 }
 0xa43   : > { %v1195_v5 = vpop.f32.mrf.mxu0 }
 0xa44   : > { %v1201_v6 = vpack.c.bf16 %v1195_v5, %v1195_v5 }
 0xa45   : > { %v2693_v7 = vpop.f32.mrf.mxu0 }
 0xa46   : > { %2698 = vmatmul.mubr.msk.bf16.vlgmr.msra.gmra.mxu1 %vm777_vm3, %v1201_v6 }
 0xa47   : > { %v1198_v8 = vpop.f32.mrf.mxu0  ;;  %2709 = vmatprep.mubr.msk.bf16.mxu1 %vm3060_vm2, %v3059_v17 }
 0xa49   : > { %v2694_v9 = vpop.f32.mrf.mxu0 }
 0xa4b   : > { %v1294_v10 = vpop.f32.mrf.mxu0 }
 0xa4c   : > { %v1300_v11 = vsel %vm777_vm3, %v1294_v10, -inf }
 0xa4d   : > { %1301 = vmax.xlane.f32.xlu0 %v1300_v11  ;;  %v2705_v12 = vpop.f32.mrf.mxu0 }
 0xa4f   : > { %v1297_v13 = vpop.f32.mrf.mxu0 }
 0xa51   : > { %v2706_v14 = vpop.f32.mrf.mxu0 }
 0xa63   : > { %1312 = vrot.lane.b32.xlu0 %v3322_v43, %s3071_s29  ;;  %v1086_v43 = vadd.f32 %v3383_v36, %v3388_v41  ;;  %v3454_v41 = vsel %vm841_vm4, %v1361_v40, 0 }
 0xa64   : > { %2714 = vmatpush3.bf16.msra.mxu0 %v3454_v41 }
 0xa65   : > { %2725 = vmatprep.subr.bf16.mxu0 %v3059_v17 }
 0xa67   : > { %1521 = vrot.lane.b32.xlu0 %v3421_v15, %s3062_s14 }
 0xad6   : > { %v1302_v16 = vpop.xlane.xlu0 %1301 }
 0xad7   : > { %v1303_v18 = vsub.f32 %v1294_v10, %v1302_v16 }
 0xad9   : > { %v1304_v19 = vmul.f32 1.442695, %v1303_v18 }
 0xada   : > { %v1313_v20 = vpop.permute.xlu0 %1312 }
 0xadb   : > { %2933 = vpow2.f32 %v1304_v19  ;;  %v1318_v22 = vsel %vm841_vm4, %v1313_v20, 0 }
 0xadc   : > { %2708 = vmatpush3.bf16.msra.mxu1 %v1318_v22 }
 0xadd   : > { %2719 = vmatprep.subr.bf16.mxu1 %v3059_v17 }
 0xade   : > { %v1522_v36 = vpop.permute.xlu0 %1521 }
 0xadf   : > { %v1527_v38 = vsel %vm777_vm3, %v1522_v36, 0 }
 0xae8   : > { %v2934_v23 = vpop.eup %2933 }
 0xae9   : > { %v1306_v24 = vsel %vm777_vm3, %v2934_v23, 0.0 }
 0xaea   : > { %1307 = vadd.xlane.f32.xlu1 %v1306_v24 }
 0xafb   : > { %1410 = vrot.lane.b32.xlu1 %v3421_v15, %s3061_s22  ;;  %s3729_s22 = sld [smem:[#allocation22_spill]] }
 0xaff   : > { %1519 = vrot.lane.b32.xlu1 %v3421_v15, %s3064_s15 }
 0xb06   : > { %v1243_v25 = vpop.f32.mrf.mxu1 }
 0xb07   : > { %v3434_v26 = vadd.f32 %v1243_v25, %v1086_v43 }
 0xb08   : > { %v2699_v28 = vpop.f32.mrf.mxu1 }
 0xb0a   : > { %v1246_v29 = vpop.f32.mrf.mxu1 }
 0xb0c   : > { %v2700_v30 = vpop.f32.mrf.mxu1 }
 0xb73   : > { %v1308_v31 = vpop.xlane.xlu1 %1307 }
 0xb74   : > { %2935 = vrcp.f32 %v1308_v31 }
 0xb77   : > { %v1411_v34 = vpop.permute.xlu1 %1410 }
 0xb78   : > { %v1416_v37 = vsel %vm777_vm3, %v1411_v34, 0 }
 0xb7b   : > { %v1520_v39 = vpop.permute.xlu1 %1519 }
 0xb81   : > { %v2936_v32 = vpop.eup %2935 }
 0xb82   : > { %v1310_v33 = vmul.f32 %v2936_v32, %v2934_v23 }
 0xb84   : > { %v1311_v35 = vpack.c.bf16 %v1310_v33, %v1310_v33 }
 0xb86   : > { %2710 = vmatmul.mubr.msk.bf16.vlgmr.msra.gmra.mxu1 %vm777_vm3, %v1311_v35 }
 0xb87   : > { %2720 = vmatpush3.bf16.xpose.msra.mxu1 %v1416_v37  ;;  %2721 = vmatprep.mubr.msk.bf16.mxu1 %vm3060_vm2, %v3059_v17 }
 0xb88   : > { %2731 = vmatprep.subr.bf16.mxu1 %v3059_v17 }
 0xb8e   : > { %2722 = vmatmul.mubr.msk.bf16.vlgmr.msra.gmra.mxu1 %vm777_vm3, %v3421_v15 }
 0xb8f   : > { %2732 = vmatpush3.bf16.xpose.msra.mxu1 %v1527_v38  ;;  %2733 = vmatprep.mubr.msk.bf16.mxu1 %vm3060_vm2, %v3059_v17 }
 0xb90   : > { %2743 = vmatprep.subr.bf16.mxu1 %v3059_v17 }
 0xb96   : > { %2734 = vmatmul.mubr.msk.bf16.vlgmr.msra.gmra.mxu1 %vm777_vm3, %v1520_v39 }
 0xb97   : > { %2744 = vmatpush3.bf16.msra.mxu1 %v3362_v21  ;;  %2745 = vmatprep.mubr.msk.bf16.mxu1 %vm3060_vm2, %v3059_v17 }
 0xb98   : > { %2755 = vmatprep.subr.bf16.mxu1 %v3059_v17 }
 0xc46   : > { %v1354_v42 = vpop.f32.mrf.mxu1 }
 0xc47   : > { %v1360_v44 = vpack.c.bf16 %v1354_v42, %v1354_v42 }
 0xc48   : > { %v2711_v45 = vpop.f32.mrf.mxu1 }
 0xc49   : > { %2716 = vmatmul.mubr.msk.bf16.vlgmr.msra.gmra.mxu0 %vm777_vm3, %v1360_v44 }
 0xc4a   : > { %v1357_v46 = vpop.f32.mrf.mxu1  ;;  %2727 = vmatprep.mubr.msk.bf16.mxu0 %vm3060_vm2, %v3059_v17 }
 0xc4c   : > { %v2712_v21 = vpop.f32.mrf.mxu1 }
 0xc4e   : > { %v1452_v47 = vpop.f32.mrf.mxu1 }
 0xc4f   : > { %v1458_v48 = vsel %vm777_vm3, %v1452_v47, -inf }
 0xc50   : > { %1459 = vmax.xlane.f32.xlu0 %v1458_v48  ;;  %v2723_v49 = vpop.f32.mrf.mxu1 }
 0xc52   : > { %v1455_v50 = vpop.f32.mrf.mxu1 }
 0xc54   : > { %v2724_v51 = vpop.f32.mrf.mxu1 }
 0xc56   : > { %v1563_v52 = vpop.f32.mrf.mxu1 }
 0xc57   : > { %v1569_v53 = vsel %vm777_vm3, %v1563_v52, -inf }
 0xc58   : > { %1570 = vmax.xlane.f32.xlu1 %v1569_v53  ;;  %v2735_v54 = vpop.f32.mrf.mxu1 }
 0xc5a   : > { %v1566_v55 = vpop.f32.mrf.mxu1 }
 0xc5c   : > { %v2736_v56 = vpop.f32.mrf.mxu1 }
 0xc69   : > { %1581 = vrot.lane.b32.xlu1 %v3421_v15, %s3065_s21  ;;  %s3731_s21 = sld [smem:[#allocation9_spill]] }
 0xc6d   : > { %1718 = vrot.lane.b32.xlu1 %v3421_v15, %s3067_s3 }
 0xc6f   : > { %p2564_p1 = scmp.ne.s32.totalorder %s3731_s21, 1 }
 0xc71   : > { %1716 = vrot.lane.b32.xlu1 %v3421_v15, %s3066_s20 }
 0xcd9   : > { %v1460_v57 = vpop.xlane.xlu0 %1459 }
 0xcda   : > { %v1461_v58 = vsub.f32 %v1452_v47, %v1460_v57 }
 0xcdc   : > { %v1462_v59 = vmul.f32 1.442695, %v1461_v58 }
 0xcde   : > { %2937 = vpow2.f32 %v1462_v59 }
 0xce1   : > { %v1571_v60 = vpop.xlane.xlu1 %1570 }
 0xce2   : > { %v1572_v61 = vsub.f32 %v1563_v52, %v1571_v60 }
 0xce4   : > { %v1573_v62 = vmul.f32 1.442695, %v1572_v61 }
 0xce5   : > { %v1582_v19 = vpop.permute.xlu1 %1581 }
 0xce6   : > { %2939 = vpow2.f32 %v1573_v62  ;;  %v1587_v22 = vsel %vm841_vm4, %v1582_v19, 0 }
 0xce9   : > { %v1719_v31 = vpop.permute.xlu1 %1718 }
 0xceb   : > { %v2938_v63 = vpop.eup %2937 }
 0xcec   : > { %v1464_v0 = vsel %vm777_vm3, %v2938_v63, 0.0 }
 0xced   : > { %1465 = vadd.xlane.f32.xlu0 %v1464_v0  ;;  %v1717_v36 = vpop.permute.xlu1 %1716 }
 0xcf3   : > { %v2940_v1 = vpop.eup %2939 }
 0xcf4   : > { %v1575_v5 = vsel %vm777_vm3, %v2940_v1, 0.0 }
 0xcf5   : > { %1576 = vadd.xlane.f32.xlu0 %v1575_v5 }
 0xd09   : > { %v1402_v6 = vpop.f32.mrf.mxu0 }
 0xd0a   : > { %v3472_v7 = vadd.f32 %v1402_v6, %v3434_v26 }
 0xd0b   : > { %v2717_v8 = vpop.f32.mrf.mxu0  ;;  %1470 = vrot.lane.b32.xlu0 %v3421_v15, %s3063_s24 }
 0xd0d   : > { %v1405_v9 = vpop.f32.mrf.mxu0 }
 0xd0f   : > { %v2718_v10 = vpop.f32.mrf.mxu0 }
 0xd10   : > { %v2026_v10 = vadd.f32 %v3472_v7, %v3282_v2 }
 0xd76   : > { %v1466_v11 = vpop.xlane.xlu0 %1465 }
 0xd77   : > { %2941 = vrcp.f32 %v1466_v11 }
 0xd7e   : > { %v1577_v12 = vpop.xlane.xlu0 %1576 }
 0xd7f   : > { %2943 = vrcp.f32 %v1577_v12 }
 0xd82   : > { %v1471_v13 = vpop.permute.xlu0 %1470 }
 0xd83   : > { %v1476_v14 = vsel %vm841_vm4, %v1471_v13, 0 }
 0xd84   : > { %v2942_v16 = vpop.eup %2941  ;;  %2726 = vmatpush3.bf16.msra.mxu0 %v1476_v14 }
 0xd85   : > { %2737 = vmatprep.subr.bf16.mxu0 %v3059_v17  ;;  %v1468_v18 = vmul.f32 %v2942_v16, %v2938_v63 }
 0xd87   : > { %v1469_v20 = vpack.c.bf16 %v1468_v18, %v1468_v18 }
 0xd89   : > { %2728 = vmatmul.mubr.msk.bf16.vlgmr.msra.gmra.mxu0 %vm777_vm3, %v1469_v20 }
 0xd8a   : > { %2738 = vmatpush3.bf16.msra.mxu0 %v1587_v22  ;;  %2739 = vmatprep.mubr.msk.bf16.mxu0 %vm3060_vm2, %v3059_v17 }
 0xd8b   : > { %2749 = vmatprep.subr.bf16.mxu0 %v3059_v17 }
 0xd8c   : > { %v2944_v23 = vpop.eup %2943 }
 0xd8d   : > { %v1579_v24 = vmul.f32 %v2944_v23, %v2940_v1 }
 0xd8f   : > { %v1580_v43 = vpack.c.bf16 %v1579_v24, %v1579_v24 }
 0xd91   : > { %2740 = vmatmul.mubr.msk.bf16.vlgmr.msra.gmra.mxu0 %vm777_vm3, %v1580_v43 }
 0xd92   : > { %2750 = vmatpush3.bf16.msra.mxu0 %v3368_v27  ;;  %2751 = vmatprep.mubr.msk.bf16.mxu0 %vm3060_vm2, %v3059_v17  ;;  %v1724_v27 = vsel %vm777_vm3, %v1719_v31, 0 }
 0xd93   : > { %2761 = vmatprep.subr.bf16.mxu0 %v3059_v17 }
 0xe49   : > { %v1512_v25 = vpop.f32.mrf.mxu0 }
 0xe4a   : > { %v1518_v26 = vpack.c.bf16 %v1512_v25, %v1512_v25 }
 0xe4b   : > { %v2729_v28 = vpop.f32.mrf.mxu0 }
 0xe4c   : > { %2752 = vmatmul.mubr.msk.bf16.vlgmr.msra.gmra.mxu0 %vm777_vm3, %v1518_v26 }
 0xe4d   : > { %v1515_v29 = vpop.f32.mrf.mxu0  ;;  %2763 = vmatprep.mubr.msk.bf16.mxu0 %vm3060_vm2, %v3059_v17 }
 0xe4f   : > { %v2730_v30 = vpop.f32.mrf.mxu0 }
 0xe51   : > { %v1623_v32 = vpop.f32.mrf.mxu0 }
 0xe52   : > { %v1629_v33 = vpack.c.bf16 %v1623_v32, %v1623_v32 }
 0xe53   : > { %v2741_v34 = vpop.f32.mrf.mxu0 }
 0xe54   : > { %2746 = vmatmul.mubr.msk.bf16.vlgmr.msra.gmra.mxu1 %vm777_vm3, %v1629_v33 }
 0xe55   : > { %2756 = vmatpush3.bf16.xpose.msra.mxu1 %v1724_v27  ;;  %v1626_v35 = vpop.f32.mrf.mxu0  ;;  %2757 = vmatprep.mubr.msk.bf16.mxu1 %vm3060_vm2, %v3059_v17 }
 0xe56   : > { %2767 = vmatprep.subr.bf16.mxu1 %v3059_v17 }
 0xe57   : > { %v2742_v37 = vpop.f32.mrf.mxu0 }
 0xe5c   : > { %2758 = vmatmul.mubr.msk.bf16.vlgmr.msra.gmra.mxu1 %vm777_vm3, %v1717_v36 }
 0xe5d   : > { %2768 = vmatpush3.bf16.msra.mxu1 %v3410_v4  ;;  %2769 = vmatprep.mubr.msk.bf16.mxu1 %vm3060_vm2, %v3059_v17 }
 0xe5e   : > { %2779 = vmatprep.subr.bf16.mxu1 %v3059_v17 }
 0xf0c   : > { %v1710_v38 = vpop.f32.mrf.mxu0 }
 0xf0e   : > { %v2753_v39 = vpop.f32.mrf.mxu0 }
 0xf10   : > { %v1713_v40 = vpop.f32.mrf.mxu0 }
 0xf12   : > { %v2754_v42 = vpop.f32.mrf.mxu0 }
 0xf14   : > { %v1667_v44 = vpop.f32.mrf.mxu1 }
 0xf15   : > { %v3501_v45 = vadd.f32 %v1710_v38, %v1667_v44 }
 0xf16   : > { %v2747_v46 = vpop.f32.mrf.mxu1 }
 0xf18   : > { %v1670_v21 = vpop.f32.mrf.mxu1 }
 0xf1a   : > { %v2748_v47 = vpop.f32.mrf.mxu1 }
 0xf1c   : > { %v1760_v48 = vpop.f32.mrf.mxu1 }
 0xf1d   : > { %v1766_v49 = vsel %vm777_vm3, %v1760_v48, -inf }
 0xf1e   : > { %1767 = vmax.xlane.f32.xlu0 %v1766_v49  ;;  %v2759_v4 = vpop.f32.mrf.mxu1 }
 0xf20   : > { %v1763_v50 = vpop.f32.mrf.mxu1 }
 0xf22   : > { %v2760_v51 = vpop.f32.mrf.mxu1 }
 0xf34   : > { %1778 = vrot.lane.b32.xlu0 %v3421_v15, %s3070_s27 }
 0xf38   : > { %1871 = vrot.lane.b32.xlu0 %v3421_v15, %s3069_s13 }
 0xfa7   : > { %v1768_v52 = vpop.xlane.xlu0 %1767 }
 0xfa8   : > { %v1769_v53 = vsub.f32 %v1760_v48, %v1768_v52 }
 0xfaa   : > { %v1770_v54 = vmul.f32 1.442695, %v1769_v53 }
 0xfab   : > { %v1779_v55 = vpop.permute.xlu0 %1778 }
 0xfac   : > { %2945 = vpow2.f32 %v1770_v54  ;;  %v1784_v56 = vsel %vm841_vm4, %v1779_v55, 0 }
 0xfad   : > { %2762 = vmatpush3.bf16.msra.mxu0 %v1784_v56  ;;  %v2907_v56 = vld [vmem:[%s3263_s17 + $0x8] sm:$0xff]  }
 0xfae   : > { %2773 = vmatprep.subr.bf16.mxu0 %v3059_v17 }
 0xfaf   : > { %v1872_v1 = vpop.permute.xlu0 %1871 }
 0xfb9   : > { %v2946_v57 = vpop.eup %2945 }
 0xfba   : > { %v1772_v58 = vsel %vm777_vm3, %v2946_v57, 0.0 }
 0xfbb   : > { %1773 = vadd.xlane.f32.xlu1 %v1772_v58 }
 0xfcc   : > { %1873 = vrot.lane.b32.xlu1 %v3421_v15, %s3068_s5 }
0x1044   : > { %v1774_v59 = vpop.xlane.xlu1 %1773 }
0x1045   : > { %2947 = vrcp.f32 %v1774_v59 }
0x1048   : > { %v1874_v62 = vpop.permute.xlu1 %1873 }
0x1049   : > { %v1879_v0 = vsel %vm777_vm3, %v1874_v62, 0 }
0x1052   : > { %v2948_v60 = vpop.eup %2947 }
0x1053   : > { %v1776_v61 = vmul.f32 %v2948_v60, %v2946_v57  ;;  %v2908_v57 = vld [vmem:[%s3263_s17] sm:$0xff]   ;;  %s3730_s17 = scalar_lea.vmem %s3729_s22, %s3220_s30 }
0x1055   : > { %v1777_v63 = vpack.c.bf16 %v1776_v61, %v1776_v61 }
0x1057   : > { %2764 = vmatmul.mubr.msk.bf16.vlgmr.msra.gmra.mxu0 %vm777_vm3, %v1777_v63 }
0x1058   : > { %2774 = vmatpush3.bf16.xpose.msra.mxu0 %v1879_v0  ;;  %2775 = vmatprep.mubr.msk.bf16.mxu0 %vm3060_vm2, %v3059_v17 }
0x1059   : > { %2785 = vmatprep.subr.bf16.mxu0 %v3059_v17 }
0x105f   : > { %2776 = vmatmul.mubr.msk.bf16.vlgmr.msra.gmra.mxu0 %vm777_vm3, %v1872_v1 }
0x1060   : > { %2786 = vmatpush3.bf16.msra.mxu0 %v3454_v41  ;;  %2787 = vmatprep.mubr.msk.bf16.mxu0 %vm3060_vm2, %v3059_v17  ;;  %v2546_v41 = vld [vmem:[%s3728_s16] ss:$0 sm:$0xff] }
0x1061   : > { %2799 = vmatprep.subr.bf16.mxu0 %v3059_v17  ;;  %v3533_v13 = vadd.f32 %v2546_v41, %v2026_v10  ;;  %v2548_v10 = vld [vmem:[%s628_s0] ss:$0 sm:$0xff] }
0x1063   : > { %v2039_v19 = vsel %vm661_vm1, %v3533_v13, 0.0 }
0x1117   : > { %v1820_v5 = vpop.f32.mrf.mxu0 }
0x1118   : > { %v1826_v6 = vpack.c.bf16 %v1820_v5, %v1820_v5  ;;  %v2547_v5 = vld [vmem:[%s3730_s17] ss:$0 sm:$0xff] }
0x1119   : > { %v2765_v8 = vpop.f32.mrf.mxu0 }
0x111a   : > { %2770 = vmatmul.mubr.msk.bf16.vlgmr.msra.gmra.mxu1 %vm777_vm3, %v1826_v6 }
0x111b   : > { %v1823_v9 = vpop.f32.mrf.mxu0  ;;  %2781 = vmatprep.mubr.msk.bf16.mxu1 %vm3060_vm2, %v3059_v17 }
0x111d   : > { %v2766_v11 = vpop.f32.mrf.mxu0 }
0x111f   : > { %v1915_v12 = vpop.f32.mrf.mxu0 }
0x1120   : > { %v1921_v14 = vsel %vm777_vm3, %v1915_v12, -inf }
0x1121   : > { %1922 = vmax.xlane.f32.xlu1 %v1921_v14  ;;  %v2777_v16 = vpop.f32.mrf.mxu0 }
0x1122   : > { %v2909_v16 = vld [vmem:[%s3277_s7 + $0x38] sm:$0xff]  }
0x1123   : > { %v1918_v18 = vpop.f32.mrf.mxu0 }
0x1124   : > { %v2910_v18 = vld [vmem:[%s3277_s7 + $0x30] sm:$0xff]  }
0x1125   : > { %2040 = vadd.xlane.f32.xlu1 %v2039_v19  ;;  %v2778_v20 = vpop.f32.mrf.mxu0  ;;  %v2911_v19 = vld [vmem:[%s3277_s7 + $0x28] sm:$0xff]  }
0x1126   : > { %v2912_v20 = vld [vmem:[%s3277_s7 + $0x20] sm:$0xff]  }
0x11aa   : > { %v1923_v2 = vpop.xlane.xlu1 %1922 }
0x11ab   : > { %v1924_v7 = vsub.f32 %v1915_v12, %v1923_v2  ;;  %v2913_v2 = vld [vmem:[%s3277_s7 + $0x18] sm:$0xff]  }
0x11ad   : > { %v1925_v22 = vmul.f32 1.442695, %v1924_v7  ;;  %v2914_v7 = vld [vmem:[%s3277_s7 + $0x10] sm:$0xff]  }
0x11ae   : > { %v2041_v39 = vpop.xlane.xlu1 %2040 }
0x11af   : > { %2949 = vpow2.f32 %v1925_v22  ;;  %v2045_v40 = vmul.f32 0.03125, %v2041_v39  ;;  %v2915_v22 = vld [vmem:[%s3277_s7 + $0x8] sm:$0xff]  }
0x11b1   : > { %v2047_v46 = vsub.f32 %v3533_v13, %v2045_v40 }
0x11b3   : > { %v2049_v50 = vmul.f32 %v2047_v46, %v2047_v46 }
0x11b5   : > { %v2051_v51 = vsel %vm661_vm1, %v2049_v50, 0.0 }
0x11bc   : > { %v2950_v23 = vpop.eup %2949 }
0x11bd   : > { %v1927_v24 = vsel %vm777_vm3, %v2950_v23, 0.0 }
0x11be   : > { %1928 = vadd.xlane.f32.xlu0 %v1927_v24  ;;  %v2549_v24 = vld [vmem:[%s636_s11] ss:$0 sm:$0xff] }
0x11d4   : > { %1933 = vrot.lane.b32.xlu0 %v3421_v15, %s3071_s29 }
0x11da   : > { %v1864_v43 = vpop.f32.mrf.mxu1 }
0x11db   : > { %v1870_v25 = vadd.f32 %v1864_v43, %v3501_v45 }
0x11dc   : > { %v2771_v26 = vpop.f32.mrf.mxu1 }
0x11de   : > { %v1867_v28 = vpop.f32.mrf.mxu1 }
0x11e0   : > { %v2772_v29 = vpop.f32.mrf.mxu1 }
0x1247   : > { %v1929_v30 = vpop.xlane.xlu0 %1928 }
0x1248   : > { %2951 = vrcp.f32 %v1929_v30 }
0x124b   : > { %v1934_v31 = vpop.permute.xlu0 %1933 }
0x124c   : > { %v1939_v32 = vsel %vm841_vm4, %v1934_v31, 0 }
0x124d   : > { %2780 = vmatpush3.bf16.msra.mxu1 %v1939_v32 }
0x124e   : > { %2791 = vmatprep.subr.bf16.mxu1 %v3059_v17 }
0x1255   : > { %v2952_v33 = vpop.eup %2951 }
0x1256   : > { %v1931_v34 = vmul.f32 %v2952_v33, %v2950_v23  ;;  %v2916_v23 = vld [vmem:[%s3277_s7] sm:$0xff]  }
0x1258   : > { %v1932_v27 = vpack.c.bf16 %v1931_v34, %v1931_v34 }
0x125a   : > { %2782 = vmatmul.mubr.msk.bf16.vlgmr.msra.gmra.mxu1 %vm777_vm3, %v1932_v27 }
0x125b   : > { %2795 = vmatprep.mubr.msk.bf16.mxu1 %vm3060_vm2, %v3059_v17  ;;  %2792 = vmatpush3.bf16.msra.mxu1 %v2907_v56 }
0x125c   : > { %2793 = vmatprep.subr.bf16.mxu1 %v3059_v17 }
0x125f   : > { %2794 = vmatpush3.bf16.msra.mxu1 %v2908_v57 }
0x131a   : > { %v1975_v15 = vpop.f32.mrf.mxu1 }
0x131b   : > { %v1981_v35 = vpack.c.bf16 %v1975_v15, %v1975_v15 }
0x131c   : > { %v2783_v37 = vpop.f32.mrf.mxu1 }
0x131d   : > { %2788 = vmatmul.mubr.msk.bf16.vlgmr.msra.gmra.mxu0 %vm777_vm3, %v1981_v35 }
0x131e   : > { %v1978_v36 = vpop.f32.mrf.mxu1  ;;  %2815 = vmatprep.mubr.msk.bf16.mxu0 %vm3060_vm2, %v3059_v17  ;;  %2800 = vmatpush3.bf16.msra.mxu0 %v2909_v16 }
0x131f   : > { %2801 = vmatprep.subr.bf16.mxu0 %v3059_v17 }
0x1320   : > { %v2784_v38 = vpop.f32.mrf.mxu1 }
0x1322   : > { %2802 = vmatpush3.bf16.msra.mxu0 %v2910_v18 }
0x1323   : > { %2803 = vmatprep.subr.bf16.mxu0 %v3059_v17 }
0x1326   : > { %2804 = vmatpush3.bf16.msra.mxu0 %v2911_v19 }
0x1327   : > { %2805 = vmatprep.subr.bf16.mxu0 %v3059_v17 }
0x132a   : > { %2806 = vmatpush3.bf16.msra.mxu0 %v2912_v20 }
0x132b   : > { %2807 = vmatprep.subr.bf16.mxu0 %v3059_v17 }
0x132e   : > { %2808 = vmatpush3.bf16.msra.mxu0 %v2913_v2 }
0x132f   : > { %2809 = vmatprep.subr.bf16.mxu0 %v3059_v17 }
0x1332   : > { %2810 = vmatpush3.bf16.msra.mxu0 %v2914_v7 }
0x1333   : > { %2811 = vmatprep.subr.bf16.mxu0 %v3059_v17 }
0x1336   : > { %2812 = vmatpush3.bf16.msra.mxu0 %v2915_v22 }
0x1337   : > { %2813 = vmatprep.subr.bf16.mxu0 %v3059_v17 }
0x133a   : > { %2814 = vmatpush3.bf16.msra.mxu0 %v2916_v23 }
0x13dd   : > { %v2019_v42 = vpop.f32.mrf.mxu0 }
0x13de   : > { %v2025_v44 = vadd.f32 %v2019_v42, %v1870_v25 }
0x13df   : > { %v2789_v45 = vpop.f32.mrf.mxu0 }
0x13e0   : > { %v2027_v21 = vadd.f32 %v2025_v44, %v3284_v3  ;;  %v2563_v44 = vld [vmem:[%s644_s25] ss:$0 sm:$0xff] }
0x13e1   : > { %v2022_v47 = vpop.f32.mrf.mxu0 }
0x13e2   : > { %v3552_v48 = vadd.f32 %v2546_v41, %v2027_v21 }
0x13e3   : > { %v2790_v49 = vpop.f32.mrf.mxu0 }
0x13e4   : > { %v2042_v4 = vsel %vm661_vm1, %v3552_v48, 0.0 }
0x13e5   : > { %2043 = vadd.xlane.f32.xlu1 %v2042_v4 }
0x13e9   : > { %2052 = vadd.xlane.f32.xlu1 %v2051_v51 }
0x146e   : > { %v2044_v52 = vpop.xlane.xlu1 %2043 }
0x146f   : > { %v2046_v53 = vmul.f32 0.03125, %v2044_v52 }
0x1471   : > { %v2048_v54 = vsub.f32 %v3552_v48, %v2046_v53 }
0x1472   : > { %v2053_v58 = vpop.xlane.xlu1 %2052 }
0x1473   : > { %v2050_v55 = vmul.f32 %v2048_v54, %v2048_v54  ;;  %v2057_v59 = vmul.f32 0.03125, %v2053_v58 }
0x1475   : > { %v2054_v3 = vsel %vm661_vm1, %v2050_v55, 0.0  ;;  %v2059_v60 = vadd.f32 1e-05, %v2057_v59 }
0x1476   : > { %2055 = vadd.xlane.f32.xlu1 %v2054_v3 }
0x1477   : > { %2953 = vrsqrt.f32 %v2059_v60 }
0x1484   : > { %v2954_v0 = vpop.eup %2953 }
0x1485   : > { %v2063_v1 = vmul.f32 %v2954_v0, %v2047_v46 }
0x1487   : > { %v2071_v9 = vmul.f32 %v2547_v5, %v2063_v1 }
0x1489   : > { %v2079_v11 = vadd.f32 %v2548_v10, %v2071_v9 }
0x14ff   : > { %v2056_v61 = vpop.xlane.xlu1 %2055 }
0x1500   : > { %v2058_v62 = vmul.f32 0.03125, %v2056_v61 }
0x1502   : > { %v2060_v63 = vadd.f32 1e-05, %v2058_v62 }
0x1504   : > { %2955 = vrsqrt.f32 %v2060_v63 }
0x1511   : > { %v2956_v6 = vpop.eup %2955 }
0x1512   : > { %v2064_v8 = vmul.f32 %v2956_v6, %v2048_v54 }
0x1514   : > { %v2072_v41 = vmul.f32 %v2547_v5, %v2064_v8 }
0x1516   : > { %v2080_v12 = vadd.f32 %v2548_v10, %v2072_v41 }
0x1518   : > { %v2081_v14 = vpack.c.bf16 %v2080_v12, %v2079_v11 }
0x151a   : > { %2796 = vmatmul.mubr.msk.bf16.vlgmr.msra.gmra.mxu1 %vm661_vm1, %v2081_v14 }
0x15da   : > { %v2142_v43 = vpop.f32.mrf.mxu1 }
0x15db   : > { %v2143_v25 = vadd.f32 %v2549_v24, %v2142_v43 }
0x15dc   : > { %v2797_v26 = vpop.f32.mrf.mxu1 }
0x15dd   : > { %v2553_v28 = vmul.f32 -1.702, %v2143_v25 }
0x15de   : > { %v2145_v29 = vpop.f32.mrf.mxu1 }
0x15df   : > { %v2153_v30 = vmul.f32 1.442695, %v2553_v28  ;;  %v2146_v31 = vadd.f32 %v2549_v24, %v2145_v29 }
0x15e0   : > { %v2798_v32 = vpop.f32.mrf.mxu1 }
0x15e1   : > { %2957 = vpow2.f32 %v2153_v30  ;;  %v2554_v33 = vmul.f32 -1.702, %v2146_v31 }
0x15e3   : > { %v2155_v34 = vmul.f32 1.442695, %v2554_v33 }
0x15e5   : > { %2959 = vpow2.f32 %v2155_v34 }
0x15ee   : > { %v2958_v17 = vpop.eup %2957 }
0x15ef   : > { %v2157_v27 = vadd.f32 1.0, %v2958_v17 }
0x15f1   : > { %2961 = vrcp.f32 %v2157_v27 }
0x15f2   : > { %v2960_v15 = vpop.eup %2959 }
0x15f3   : > { %v2158_v35 = vadd.f32 1.0, %v2960_v15 }
0x15f5   : > { %2963 = vrcp.f32 %v2158_v35 }
0x15fe   : > { %v2962_v37 = vpop.eup %2961 }
0x15ff   : > { %v2163_v38 = vmul.f32 %v2962_v37, %v2143_v25 }
0x1602   : > { %v2964_v36 = vpop.eup %2963 }
0x1603   : > { %v2164_v39 = vmul.f32 %v2964_v36, %v2146_v31 }
0x1605   : > { %v2165_v40 = vpack.c.bf16 %v2164_v39, %v2163_v38 }
0x1607   : > { %2816 = vmatmul.mubr.bf16.vlgmr.msra.gmra.mxu0 %v2165_v40 }
0x16c7   : > { %v2264_v42 = vpop.f32.mrf.mxu0 }
0x16c8   : > { %v2271_v45 = vadd.f32 %v2264_v42, %v3533_v13 }
0x16c9   : > { %v2817_v46 = vpop.f32.mrf.mxu0 }
0x16ca   : > { %v2280_v21 = vadd.f32 %v2563_v44, %v2271_v45 }
0x16cb   : > { %v2267_v47 = vpop.f32.mrf.mxu0 }
0x16cc   : > { %2282 = vst.msk [vmem:[#allocation2] sm:$0xff] %vm661_vm1, %v2280_v21  ;;  %v2272_v49 = vadd.f32 %v2267_v47, %v3552_v48  ;;  %2287 = sbr.rel (%p2564_p1) target bundleno = 5842 (0x16d2), region = 80 }
0x16cd   : > { %v2818_v4 = vpop.f32.mrf.mxu0 }
0x16ce   : > { %v2281_v50 = vadd.f32 %v2563_v44, %v2272_v49 }
0x16d0   : > { %2283 = vst.msk [vmem:[#allocation2 + $0x8] sm:$0xff] %vm661_vm1, %v2281_v50 }
0x16d1   : > { %2288 = vst.msk [vmem:[%s3279_s26] sm:$0xff] %vm661_vm1, %v2280_v21  ;;  %2565 = vst.msk [vmem:[%s3279_s26 + $0x8] sm:$0xff] %vm661_vm1, %v2281_v50 }
0x16d2 PF: > { %s3732_s30 = sld [smem:[#allocation10_spill]]  ;;  %s2305_s18 = sshll.u32 %s3279_s26, 4  ;;  %s3614_s18 = int_to_ptr.vmem [resolvable:$true] %s2305_s18 }
0x16d3   : > { %s3733_s25 = sld [smem:[#allocation7_spill]]  ;;  %s2965_s19 = scalar_lea.vmem %s3614_s18, 256 }
0x16d4   : > { %s3735_s27 = sld [smem:[#allocation24_spill]]  ;;  %p2966_p2 = scmp.ne.s32.totalorder %s3614_s18, %s2965_s19 }
0x16d5   : > { %s3072_s22 = smov [#allocation3]  }
0x16d6   : > { %p2967_p4 = pnand %p2966_p2, %p3194_p3  ;;  %s2969_s17 = sshll.u32 %s3072_s22, 4  ;;  %s2970_s17 = int_to_ptr.vmem [resolvable:$false] %s2969_s17 }
0x16d7   : > { %s2971_s14 = scalar_lea.vmem %s2970_s17, 512  ;;  %p2972_p6 = scmp.lt.s32.totalorder %s3614_s18, %s2970_s17 }
0x16d8   : > { %s2575_s3 = sshll.u32 %s3732_s30, 8  ;;  %p2968_p5 = pneg %p2967_p4 }
0x16d9   : > { %s3737_s16 = sand.u32 1, %s3733_s25   ;;  %p2973_p7 = scmp.lt.s32.totalorder %s2971_s14, %s2965_s19 }
0x16da   : > { %s3736_s23 = smov %s3735_s27  ;;  %s3611_s29 = scalar_lea.hbm %s3735_s27, %s2575_s3 }
0x16db   : > { %s3618_s28 = scalar_lea.sflag [#allocation4], %s3737_s16  ;;  %p2974_p8 = por %p2973_p7, %p2972_p6 }
0x16dd   : > { %p2975_p10 = pnand %p2974_p8, %p2968_p5 }
0x16df   : > { %2978 = shalt.err (!%p2975_p10)
}
0x16e0   : > { %s2979_s26 = scalar_lea.hbm %s3611_s29, 256  ;;  %s2983_s15 = scalar_lea.hbm %s3736_s23, 512 }
0x16e1   : > { %p2980_p11 = scmp.ne.s32.totalorder %s3611_s29, %s2979_s26  ;;  %p2984_p0 = scmp.lt.s32.totalorder %s3611_s29, %s3736_s23 }
0x16e2   : > { %p2985_p1 = scmp.lt.s32.totalorder %s2983_s15, %s2979_s26 }
0x16e3   : > { %p2981_p12 = pnand %p2980_p11, %p3194_p3 }
0x16e4   : > { %p2986_p2 = por %p2985_p1, %p2984_p0 }
0x16e5   : > { %p2982_p13 = pneg %p2981_p12 }
0x16e7   : > { %p2987_p4 = pnand %p2986_p2, %p2982_p13 }
0x16e9   : > { %2990 = shalt.err (!%p2987_p4)
}
0x16ea   : > { %s3073_s21 = smov 128   ;;  %s3074_s30 = smov 8  }
0x16eb   : > { %2819 = dma.vmem_to_hbm [thread:$0]  (%p3194_p3), %s3614_s18, 256, %s3611_s29, %s3618_s28, %s3073_s21, %s3073_s21, %s3074_s30  }
0x16ec PF: > { %s3738_s25 = sld [smem:[#allocation13_spill]] }
0x16ed   : > { %s3739_s3 = sld [smem:[#allocation6_spill]] }
0x16f2   : > { %p2825_p5 = scmp.ge.s32.totalorder %s3738_s25, 2 }
0x16f3   : > { %s2320_s13 = sand.u32 1, %s3739_s3  }
0x16f4   : > { %p2822_p6 = pnand %p2825_p5, %p3204_p9  ;;  %s2321_s27 = scalar_lea.sflag [#allocation4], %s2320_s13 }
0x16f6   : > { %p2823_p7 = pneg %p2822_p6 }
0x16f8   : > { %3024 = dma.done.wait (%p2823_p7), %s2321_s27, 256  }
0x16f9   : > { %3026 = vsyncadd (%p2823_p7), %s2321_s27, 4294967040  ;;  %s26_s15 = sadd.s32 1, %s3738_s25   ;;  %s3741_s25 = sld [smem:[#allocation7_spill]] }
0x16fa   : > { %p23_p8 = scmp.ge.s32.totalorder %s26_s15, 6   ;;  %s3742_s26 = sld [smem:[#allocation8_spill]] }
0x16fb   : > { %s3743_s27 = sld [smem:[#allocation18_spill]] }
0x16fc   : > { %s3744_s28 = sld [smem:[#allocation11_spill]]  ;;  %25 = sbr.rel (!%p23_p8) target bundleno = 12 (0xc), region = 153 }
0x16fd   : > { %s3745_s29 = sld [smem:[#allocation12_spill]] }
0x16fe   : > { %s3746_s30 = sld [smem:[#allocation14_spill]] }
0x16ff   : > { %s3747_s14 = sld [smem:[#allocation16_spill]] }
0x1701   :  { %2326 = vsyncpa [#allocation4], 1 }
0x1702   :  { %2328 = vsyncpa [#allocation4 + $0x1], 1 }

</bundles_post_ra>
